<compile_context>
chip_gen: v7x
topology: tpu7x:2x2x1
jax: 0.10.0
libtpu: 0.0.40
codegen_flags: <defaults>
</compile_context>

<pallas_src>
import functools

import jax
import jax.numpy as jnp
from jax.experimental import pallas as pl
from jax.experimental.pallas import tpu as pltpu


def _round_up(a, b):
    return (a + b - 1) // b * b


# ----------------------------------------------------------------------------------
# Pallas kernel: grid = (phase, row tile i)
# ----------------------------------------------------------------------------------
def gcn_res_block_kernel(x_ref, adj_ref, w1_ref, w2_ref, bn_ref,
                         o_ref,
                         h_src, p_store, stats,
                         *, num_valid, tile_m, eps=1e-5):
    phase = pl.program_id(0)
    i = pl.program_id(1)

    inv_n = 1.0 / float(num_valid)
    row0 = pl.multiple_of(i * tile_m, tile_m)

    # ---- very first grid step: clear the BN statistics accumulators --------------
    @pl.when((phase == 0) & (i == 0))
    def _():
        stats[...] = jnp.zeros_like(stats)

    # ---- phase 0: per-tile feature transform h_src[i] = bf16(X[i] @ W1) -----------
    @pl.when(phase == 0)
    def _():
        h_src[pl.ds(row0, tile_m), :] = jnp.dot(
            x_ref[...].astype(jnp.bfloat16), w1_ref[...],
            preferred_element_type=jnp.float32).astype(jnp.bfloat16)

    # ---- phases 1 & 3: full-width propagation of one row tile + partial BN stats --
    # (GCN bias omitted: exactly cancelled by the following batch-stat BatchNorm;
    #  padded adjacency rows are all-zero so the column sums need no row mask.)
    def propagate(stat_base):
        p = jnp.dot(adj_ref[...], h_src[...],
                    preferred_element_type=jnp.float32)          # (tile_m, P) f32
        p_store[pl.ds(row0, tile_m), :] = p
        stats[stat_base:stat_base + 1, :] += jnp.sum(p, axis=0, keepdims=True)
        stats[stat_base + 1:stat_base + 2, :] += jnp.sum(p * p, axis=0, keepdims=True)

    @pl.when(phase == 1)
    def _():
        propagate(0)

    @pl.when(phase == 3)
    def _():
        propagate(2)

    # ---- BN finalize helper: O(P) work, recomputed per tile (negligible) ----------
    def scale_shift(stat_base, bn_base):
        mean = stats[stat_base:stat_base + 1, :] * inv_n
        var = jnp.maximum(stats[stat_base + 1:stat_base + 2, :] * inv_n - mean * mean,
                          0.0)
        scale = bn_ref[bn_base:bn_base + 1, :] * jax.lax.rsqrt(var + eps)
        shift = bn_ref[bn_base + 1:bn_base + 2, :] - mean * scale
        return scale, shift

    # ---- phase 2: y1 = ReLU(BN1(p1[i])) ; h_src[i] = bf16(y1 @ W2) -----------------
    @pl.when(phase == 2)
    def _():
        scale, shift = scale_shift(0, 0)
        y1 = jnp.maximum(p_store[pl.ds(row0, tile_m), :] * scale + shift, 0.0)
        h_src[pl.ds(row0, tile_m), :] = jnp.dot(
            y1.astype(jnp.bfloat16), w2_ref[...],
            preferred_element_type=jnp.float32).astype(jnp.bfloat16)

    # ---- phase 4: out[i] = ReLU(BN2(p2[i]) + X[i]) ---------------------------------
    @pl.when(phase == 4)
    def _():
        scale, shift = scale_shift(2, 2)
        p2 = p_store[pl.ds(row0, tile_m), :]
        o_ref[...] = jnp.maximum(p2 * scale + shift + x_ref[...], 0.0)


# ----------------------------------------------------------------------------------
# Glue: dense gcn_norm adjacency (PyG GCNConv semantics, add_self_loops=True)
# ----------------------------------------------------------------------------------
def build_normalized_adjacency(edge_index, edge_weight, num_nodes):
    row, col = edge_index[0], edge_index[1]
    if edge_weight is None:
        edge_weight = jnp.ones((edge_index.shape[1],), jnp.float32)
    edge_weight = edge_weight.astype(jnp.float32)

    loop = jnp.arange(num_nodes, dtype=edge_index.dtype)
    row = jnp.concatenate([row, loop])
    col = jnp.concatenate([col, loop])
    w = jnp.concatenate([edge_weight, jnp.ones((num_nodes,), jnp.float32)])

    deg = jnp.zeros((num_nodes,), jnp.float32).at[col].add(w)
    dinv = jnp.where(deg > 0, jax.lax.rsqrt(deg), 0.0)
    norm = dinv[row] * w * dinv[col]

    # A_hat[i, j] = normalized weight of edge j -> i, so (A_hat @ H)[i] aggregates.
    adj = jnp.zeros((num_nodes, num_nodes), jnp.float32).at[col, row].add(norm)
    return adj


# ----------------------------------------------------------------------------------
# Wrapper
# ----------------------------------------------------------------------------------
def gcn_residual_block(x, edge_index, edge_weight, params, *, tile_m=256):
    # tile_m: output-row tile of the adjacency stream.  Adjacency buffers cost
    # 2 * tile_m * n_pad * 2 B; shrink tile_m (or reintroduce a k split) for very
    # large graphs.
    N, F = x.shape
    F_in, H = params["w1"].shape
    assert F == F_in
    assert F == H, "residual path requires num_input_features == hidden_dim"

    P = _round_up(max(F, H), 128)          # lane-dense feature dim
    n_pad = _round_up(N, tile_m)
    nt = n_pad // tile_m

    adj = build_normalized_adjacency(edge_index, edge_weight, N)
    adj = jnp.pad(adj, ((0, n_pad - N), (0, n_pad - N))).astype(jnp.bfloat16)

    # x stays f32 (streamed per row tile -> negligible HBM/VMEM; keeps residual
    # precision).  Padded rows / feature columns are zero.
    xp = jnp.pad(x.astype(jnp.float32), ((0, n_pad - N), (0, P - F)))

    def pad_mat(w):   # [in, out] -> [P, P]
        return jnp.pad(w.astype(jnp.float32),
                       ((0, P - w.shape[0]), (0, P - w.shape[1])))

    def pad_row(v):   # [1, H] -> [1, P]
        return jnp.pad(v.astype(jnp.float32), ((0, 0), (0, P - v.shape[1])))

    w1 = pad_mat(params["w1"]).astype(jnp.bfloat16)
    w2 = pad_mat(params["w2"]).astype(jnp.bfloat16)

    # Packed BN params, rows: [g1, be1, g2, be2, 0, 0, 0, 0].  The conv biases are
    # not passed: they are exactly cancelled by batch-stat BatchNorm.
    bn = jnp.concatenate(
        [pad_row(params["g1"]), pad_row(params["be1"]),
         pad_row(params["g2"]), pad_row(params["be2"]),
         jnp.zeros((4, P), jnp.float32)], axis=0)

    kernel = functools.partial(gcn_res_block_kernel, num_valid=N, tile_m=tile_m)

    # --- index maps (functions of the (phase, row-tile) grid indices) --------------
    def x_index(p, i):          # needed in phases 0 (X@W1) and 4 (residual)
        use = jnp.logical_or(p == 0, p == 4)
        return (jnp.where(use, i, 0), 0)

    def adj_index(p, i):        # streamed in phases 1 & 3; pinned elsewhere so the
        stream = jnp.logical_or(p == 1, p == 3)       # block index never forces a
        return (jnp.where(stream, i, jnp.where(p <= 1, 0, nt - 1)), 0)   # redundant DMA

    def out_index(p, i):        # written only in phase 4
        return (jnp.where(p == 4, i, 0), 0)

    const2 = lambda p, i: (0, 0)

    # --- VMEM budget (scratch is single-buffered, streamed inputs double-buffered) --
    vmem_need = (
        n_pad * P * (2 + 4)                 # h_src (bf16) + p_store (f32) scratch
        + 2 * tile_m * n_pad * 2            # adjacency stream, double-buffered bf16
        + 2 * tile_m * P * (4 + 4)          # x in + out, double-buffered f32
        + 2 * 2 * P * P * 2                 # w1 + w2, double-buffered bf16
        + 2 * 8 * P * 4 + 4 * P * 4         # bn vectors + stats scratch
    )
    vmem_limit = int(min(max(vmem_need * 1.25 + (4 << 20), 32 << 20), 56 << 20))

    out = pl.pallas_call(
        kernel,
        out_shape=jax.ShapeDtypeStruct((n_pad, P), jnp.float32),
        grid_spec=pltpu.PrefetchScalarGridSpec(
            num_scalar_prefetch=0,
            grid=(5, nt),                               # (phase, output row tile)
            in_specs=[
                pl.BlockSpec((tile_m, P), x_index),     # X, streamed per row tile
                pl.BlockSpec((tile_m, n_pad), adj_index),  # A_hat, full-width slabs
                pl.BlockSpec((P, P), const2),           # W1 (tiny, resident)
                pl.BlockSpec((P, P), const2),           # W2 (tiny, resident)
                pl.BlockSpec((8, P), const2),           # packed BN params
            ],
            out_specs=pl.BlockSpec((tile_m, P), out_index),
            scratch_shapes=[
                pltpu.VMEM((n_pad, P), jnp.bfloat16),   # h_src (propagation source)
                pltpu.VMEM((n_pad, P), jnp.float32),    # p_store (pre-BN activations)
                pltpu.VMEM((4, P), jnp.float32),        # BN stats: sum1,sq1,sum2,sq2
            ],
        ),
        compiler_params=pltpu.CompilerParams(
            # Phases and row tiles share h_src / p_store / stats and are globally
            # ordered by the BN dependency -> both axes must stay "arbitrary".
            dimension_semantics=("arbitrary", "arbitrary"),
            vmem_limit_bytes=vmem_limit,
        ),
    )(xp, adj, w1, w2, bn)

    return out[:N, :H]


# ----------------------------------------------------------------------------------
# Pure-JAX reference with the SAME bf16 cast points (includes the conv biases;
# they are cancelled by BatchNorm, which the test verifies empirically).
# ----------------------------------------------------------------------------------
def reference_forward(x, edge_index, edge_weight, params, eps=1e-5):
    N = x.shape[0]
    adj = build_normalized_adjacency(edge_index, edge_weight, N).astype(jnp.bfloat16)
    w1 = params["w1"].astype(jnp.bfloat16)
    w2 = params["w2"].astype(jnp.bfloat16)

    def bn(p, g, b):
        mean = jnp.mean(p, axis=0, keepdims=True)
        var = jnp.mean((p - mean) ** 2, axis=0, keepdims=True)
        return (p - mean) * jax.lax.rsqrt(var + eps) * g + b

    h = jnp.dot(x.astype(jnp.bfloat16), w1,
                preferred_element_type=jnp.float32).astype(jnp.bfloat16)
    p1 = jnp.dot(adj, h, preferred_element_type=jnp.float32) + params["b1"]
    y1 = jnp.maximum(bn(p1, params["g1"], params["be1"]), 0.0)
    h2 = jnp.dot(y1.astype(jnp.bfloat16), w2,
                 preferred_element_type=jnp.float32).astype(jnp.bfloat16)
    p2 = jnp.dot(adj, h2, preferred_element_type=jnp.float32) + params["b2"]
    y2 = bn(p2, params["g2"], params["be2"]) + x.astype(jnp.float32)
    return jnp.maximum(y2, 0.0)


# ----------------------------------------------------------------------------------
# Deterministic parameter init (GCNConv(in,out,bias=True) + BatchNorm1d(out)).
# Biases / gamma / beta are non-trivial so the test exercises the full BN path.
# ----------------------------------------------------------------------------------
def init_params(key, num_input_features, hidden_dim):
    ks = jax.random.split(key, 8)
    s1 = (6.0 / (num_input_features + hidden_dim)) ** 0.5
    s2 = (6.0 / (hidden_dim + hidden_dim)) ** 0.5
    return {
        "w1": jax.random.uniform(ks[0], (num_input_features, hidden_dim),
                                 jnp.float32, -s1, s1),
        "b1": 0.1 * jax.random.normal(ks[1], (1, hidden_dim), jnp.float32),
        "g1": 1.0 + 0.1 * jax.random.normal(ks[2], (1, hidden_dim), jnp.float32),
        "be1": 0.1 * jax.random.normal(ks[3], (1, hidden_dim), jnp.float32),
        "w2": jax.random.uniform(ks[4], (hidden_dim, hidden_dim),
                                 jnp.float32, -s2, s2),
        "b2": 0.1 * jax.random.normal(ks[5], (1, hidden_dim), jnp.float32),
        "g2": 1.0 + 0.1 * jax.random.normal(ks[6], (1, hidden_dim), jnp.float32),
        "be2": 0.1 * jax.random.normal(ks[7], (1, hidden_dim), jnp.float32),
    }


if __name__ == "__main__":
    NUM_NODES = 300        # not a tile multiple -> exercises padding + masked BN stats
    IN_FEATS = 32          # == HIDDEN so the residual branch is exercised
    HIDDEN = 32
    NUM_EDGES = 1200
    TILE_M = 128           # grid = (5, 3) at these small test shapes

    key = jax.random.PRNGKey(0)
    kx, ke, kw, kp = jax.random.split(key, 4)

    x = jax.random.normal(kx, (NUM_NODES, IN_FEATS), jnp.float32)
    edge_index = jax.random.randint(ke, (2, NUM_EDGES), 0, NUM_NODES, jnp.int32)
    edge_weight = jax.random.uniform(kw, (NUM_EDGES,), jnp.float32, 0.5, 1.5)

    params = init_params(kp, IN_FEATS, HIDDEN)

    out = gcn_residual_block(x, edge_index, edge_weight, params, tile_m=TILE_M)
    out = jax.block_until_ready(out)

    assert out.shape == (NUM_NODES, HIDDEN)
    assert bool(jnp.all(jnp.isfinite(out)))
    assert bool(jnp.all(out >= 0.0))   # final ReLU

    ref = reference_forward(x, edge_index, edge_weight, params)
    max_err = float(jnp.max(jnp.abs(out - ref)))
    assert max_err < 2e-2, f"mismatch vs reference: {max_err}"

    print("KERNEL_OK")
</pallas_src>

<mosaic_0001>
module attributes {stable_mosaic.version = 11 : i64} {
  func.func @gcn_res_block_kernel(%arg0: i32, %arg1: i32, %arg2: memref<128x128xf32, #tpu.memory_space<vmem>>, %arg3: memref<128x384xbf16, #tpu.memory_space<vmem>>, %arg4: memref<128x128xbf16, #tpu.memory_space<vmem>>, %arg5: memref<128x128xbf16, #tpu.memory_space<vmem>>, %arg6: memref<8x128xf32, #tpu.memory_space<vmem>>, %arg7: memref<128x128xf32, #tpu.memory_space<vmem>>, %arg8: memref<384x128xbf16, #tpu.memory_space<vmem>>, %arg9: memref<384x128xf32, #tpu.memory_space<vmem>>, %arg10: memref<4x128xf32, #tpu.memory_space<vmem>>) attributes {dimension_semantics = [#tpu.dimension_semantics<arbitrary>, #tpu.dimension_semantics<arbitrary>], iteration_bounds = array<i64: 5, 3>, scalar_prefetch = 0 : i64, scratch_operands = 3 : i64, tpu.core_type = #tpu.core_type<tc>, window_params = [{transform_indices = @transform_0, window_bounds = array<i64: 128, 128>}, {transform_indices = @transform_1, window_bounds = array<i64: 128, 384>}, {pipeline_mode = #tpu.pipeline_mode<synchronous>, transform_indices = @transform_2, window_bounds = array<i64: 128, 128>}, {pipeline_mode = #tpu.pipeline_mode<synchronous>, transform_indices = @transform_3, window_bounds = array<i64: 128, 128>}, {pipeline_mode = #tpu.pipeline_mode<synchronous>, transform_indices = @transform_4, window_bounds = array<i64: 8, 128>}, {transform_indices = @transform_5, window_bounds = array<i64: 128, 128>}]} {
    %c128_i32 = arith.constant 128 : i32
    %0 = arith.muli %arg1, %c128_i32 : i32
    %1 = tpu.assume_multiple %0, 128 : i32
    %c0_i32 = arith.constant 0 : i32
    %2 = arith.cmpi eq, %arg0, %c0_i32 : i32
    %c0_i32_0 = arith.constant 0 : i32
    %3 = arith.cmpi eq, %arg1, %c0_i32_0 : i32
    %4 = arith.andi %2, %3 : i1
    %5 = arith.extui %4 : i1 to i32
    %c0_i32_1 = arith.constant 0 : i32
    %6 = arith.cmpi ne, %5, %c0_i32_1 : i32
    scf.if %6 {
      %cst = arith.constant 0.000000e+00 : f32
      %22 = vector.broadcast %cst : f32 to vector<4x128xf32>
      %c0 = arith.constant 0 : index
      %c0_8 = arith.constant 0 : index
      %23 = vector.load %arg10[%c0, %c0_8] : memref<4x128xf32, #tpu.memory_space<vmem>>, vector<4x128xf32>
      tpu.vector_store %arg10[%c0, %c0_8], %22 {strides = array<i32>} : memref<4x128xf32, #tpu.memory_space<vmem>>, vector<4x128xf32>,
    } else {
    }
    %c0_i32_2 = arith.constant 0 : i32
    %7 = arith.cmpi eq, %arg0, %c0_i32_2 : i32
    %8 = arith.extui %7 : i1 to i32
    %c0_i32_3 = arith.constant 0 : i32
    %9 = arith.cmpi ne, %8, %c0_i32_3 : i32
    scf.if %9 {
      %c0 = arith.constant 0 : index
      %c0_8 = arith.constant 0 : index
      %22 = vector.load %arg2[%c0, %c0_8] : memref<128x128xf32, #tpu.memory_space<vmem>>, vector<128x128xf32>
      %23 = arith.truncf %22 : vector<128x128xf32> to vector<128x128xbf16>
      %c0_9 = arith.constant 0 : index
      %c0_10 = arith.constant 0 : index
      %24 = vector.load %arg4[%c0_9, %c0_10] : memref<128x128xbf16, #tpu.memory_space<vmem>>, vector<128x128xbf16>
      %cst = arith.constant dense<0.000000e+00> : vector<128x128xf32>
      %25 = tpu.matmul %23, %24, %cst {dimension_numbers = #tpu.dot_dimension_numbers<[1], [0], [0], [1], [0, 0, 1, 1], [], []>} : vector<128x128xbf16>, vector<128x128xbf16>, vector<128x128xf32> -> vector<128x128xf32>
      %26 = arith.truncf %25 : vector<128x128xf32> to vector<128x128xbf16>
      %27 = arith.index_cast %1 : i32 to index
      %c0_11 = arith.constant 0 : index
      %28 = vector.load %arg8[%27, %c0_11] : memref<384x128xbf16, #tpu.memory_space<vmem>>, vector<128x128xbf16>
      tpu.vector_store %arg8[%27, %c0_11], %26 {strides = array<i32>} : memref<384x128xbf16, #tpu.memory_space<vmem>>, vector<128x128xbf16>,
    } else {
    }
    %c1_i32 = arith.constant 1 : i32
    %10 = arith.cmpi eq, %arg0, %c1_i32 : i32
    %11 = arith.extui %10 : i1 to i32
    %c0_i32_4 = arith.constant 0 : i32
    %12 = arith.cmpi ne, %11, %c0_i32_4 : i32
    scf.if %12 {
      %c0 = arith.constant 0 : index
      %c0_8 = arith.constant 0 : index
      %22 = vector.load %arg3[%c0, %c0_8] : memref<128x384xbf16, #tpu.memory_space<vmem>>, vector<128x384xbf16>
      %c0_9 = arith.constant 0 : index
      %c0_10 = arith.constant 0 : index
      %23 = vector.load %arg8[%c0_9, %c0_10] : memref<384x128xbf16, #tpu.memory_space<vmem>>, vector<384x128xbf16>
      %cst = arith.constant dense<0.000000e+00> : vector<128x128xf32>
      %24 = tpu.matmul %22, %23, %cst {dimension_numbers = #tpu.dot_dimension_numbers<[1], [0], [0], [1], [0, 0, 1, 1], [], []>} : vector<128x384xbf16>, vector<384x128xbf16>, vector<128x128xf32> -> vector<128x128xf32>
      %25 = arith.index_cast %1 : i32 to index
      %c0_11 = arith.constant 0 : index
      %26 = vector.load %arg9[%25, %c0_11] : memref<384x128xf32, #tpu.memory_space<vmem>>, vector<128x128xf32>
      tpu.vector_store %arg9[%25, %c0_11], %24 {strides = array<i32>} : memref<384x128xf32, #tpu.memory_space<vmem>>, vector<128x128xf32>,
      %c0_12 = arith.constant 0 : index
      %c0_13 = arith.constant 0 : index
      %27 = vector.load %arg10[%c0_12, %c0_13] : memref<4x128xf32, #tpu.memory_space<vmem>>, vector<1x128xf32>
      %cst_14 = arith.constant dense<0.000000e+00> : vector<128xf32>
      %28 = vector.multi_reduction <add>, %24, %cst_14 [0] : vector<128x128xf32> to vector<128xf32>
      %29 = vector.shape_cast %28 : vector<128xf32> to vector<1x128xf32>
      %30 = arith.addf %27, %29 : vector<1x128xf32>
      %c0_15 = arith.constant 0 : index
      %c0_16 = arith.constant 0 : index
      %31 = vector.load %arg10[%c0_15, %c0_16] : memref<4x128xf32, #tpu.memory_space<vmem>>, vector<1x128xf32>
      tpu.vector_store %arg10[%c0_15, %c0_16], %30 {strides = array<i32>} : memref<4x128xf32, #tpu.memory_space<vmem>>, vector<1x128xf32>,
      %c1 = arith.constant 1 : index
      %c0_17 = arith.constant 0 : index
      %32 = vector.load %arg10[%c1, %c0_17] : memref<4x128xf32, #tpu.memory_space<vmem>>, vector<1x128xf32>
      %33 = arith.mulf %24, %24 : vector<128x128xf32>
      %cst_18 = arith.constant dense<0.000000e+00> : vector<128xf32>
      %34 = vector.multi_reduction <add>, %33, %cst_18 [0] : vector<128x128xf32> to vector<128xf32>
      %35 = vector.shape_cast %34 : vector<128xf32> to vector<1x128xf32>
      %36 = arith.addf %32, %35 : vector<1x128xf32>
      %c1_19 = arith.constant 1 : index
      %c0_20 = arith.constant 0 : index
      %37 = vector.load %arg10[%c1_19, %c0_20] : memref<4x128xf32, #tpu.memory_space<vmem>>, vector<1x128xf32>
      tpu.vector_store %arg10[%c1_19, %c0_20], %36 {strides = array<i32>} : memref<4x128xf32, #tpu.memory_space<vmem>>, vector<1x128xf32>,
    } else {
    }
    %c3_i32 = arith.constant 3 : i32
    %13 = arith.cmpi eq, %arg0, %c3_i32 : i32
    %14 = arith.extui %13 : i1 to i32
    %c0_i32_5 = arith.constant 0 : i32
    %15 = arith.cmpi ne, %14, %c0_i32_5 : i32
    scf.if %15 {
      %c0 = arith.constant 0 : index
      %c0_8 = arith.constant 0 : index
      %22 = vector.load %arg3[%c0, %c0_8] : memref<128x384xbf16, #tpu.memory_space<vmem>>, vector<128x384xbf16>
      %c0_9 = arith.constant 0 : index
      %c0_10 = arith.constant 0 : index
      %23 = vector.load %arg8[%c0_9, %c0_10] : memref<384x128xbf16, #tpu.memory_space<vmem>>, vector<384x128xbf16>
      %cst = arith.constant dense<0.000000e+00> : vector<128x128xf32>
      %24 = tpu.matmul %22, %23, %cst {dimension_numbers = #tpu.dot_dimension_numbers<[1], [0], [0], [1], [0, 0, 1, 1], [], []>} : vector<128x384xbf16>, vector<384x128xbf16>, vector<128x128xf32> -> vector<128x128xf32>
      %25 = arith.index_cast %1 : i32 to index
      %c0_11 = arith.constant 0 : index
      %26 = vector.load %arg9[%25, %c0_11] : memref<384x128xf32, #tpu.memory_space<vmem>>, vector<128x128xf32>
      tpu.vector_store %arg9[%25, %c0_11], %24 {strides = array<i32>} : memref<384x128xf32, #tpu.memory_space<vmem>>, vector<128x128xf32>,
      %c2 = arith.constant 2 : index
      %c0_12 = arith.constant 0 : index
      %27 = vector.load %arg10[%c2, %c0_12] : memref<4x128xf32, #tpu.memory_space<vmem>>, vector<1x128xf32>
      %cst_13 = arith.constant dense<0.000000e+00> : vector<128xf32>
      %28 = vector.multi_reduction <add>, %24, %cst_13 [0] : vector<128x128xf32> to vector<128xf32>
      %29 = vector.shape_cast %28 : vector<128xf32> to vector<1x128xf32>
      %30 = arith.addf %27, %29 : vector<1x128xf32>
      %c2_14 = arith.constant 2 : index
      %c0_15 = arith.constant 0 : index
      %31 = vector.load %arg10[%c2_14, %c0_15] : memref<4x128xf32, #tpu.memory_space<vmem>>, vector<1x128xf32>
      tpu.vector_store %arg10[%c2_14, %c0_15], %30 {strides = array<i32>} : memref<4x128xf32, #tpu.memory_space<vmem>>, vector<1x128xf32>,
      %c3 = arith.constant 3 : index
      %c0_16 = arith.constant 0 : index
      %32 = vector.load %arg10[%c3, %c0_16] : memref<4x128xf32, #tpu.memory_space<vmem>>, vector<1x128xf32>
      %33 = arith.mulf %24, %24 : vector<128x128xf32>
      %cst_17 = arith.constant dense<0.000000e+00> : vector<128xf32>
      %34 = vector.multi_reduction <add>, %33, %cst_17 [0] : vector<128x128xf32> to vector<128xf32>
      %35 = vector.shape_cast %34 : vector<128xf32> to vector<1x128xf32>
      %36 = arith.addf %32, %35 : vector<1x128xf32>
      %c3_18 = arith.constant 3 : index
      %c0_19 = arith.constant 0 : index
      %37 = vector.load %arg10[%c3_18, %c0_19] : memref<4x128xf32, #tpu.memory_space<vmem>>, vector<1x128xf32>
      tpu.vector_store %arg10[%c3_18, %c0_19], %36 {strides = array<i32>} : memref<4x128xf32, #tpu.memory_space<vmem>>, vector<1x128xf32>,
    } else {
    }
    %c2_i32 = arith.constant 2 : i32
    %16 = arith.cmpi eq, %arg0, %c2_i32 : i32
    %17 = arith.extui %16 : i1 to i32
    %c0_i32_6 = arith.constant 0 : i32
    %18 = arith.cmpi ne, %17, %c0_i32_6 : i32
    scf.if %18 {
      %c0 = arith.constant 0 : index
      %c0_8 = arith.constant 0 : index
      %22 = vector.load %arg10[%c0, %c0_8] : memref<4x128xf32, #tpu.memory_space<vmem>>, vector<1x128xf32>
      %cst = arith.constant 0.00333333341 : f32
      %23 = vector.broadcast %cst : f32 to vector<1x128xf32>
      %24 = arith.mulf %22, %23 : vector<1x128xf32>
      %c1 = arith.constant 1 : index
      %c0_9 = arith.constant 0 : index
      %25 = vector.load %arg10[%c1, %c0_9] : memref<4x128xf32, #tpu.memory_space<vmem>>, vector<1x128xf32>
      %cst_10 = arith.constant 0.00333333341 : f32
      %26 = vector.broadcast %cst_10 : f32 to vector<1x128xf32>
      %27 = arith.mulf %25, %26 : vector<1x128xf32>
      %28 = arith.mulf %24, %24 : vector<1x128xf32>
      %29 = arith.subf %27, %28 : vector<1x128xf32>
      %cst_11 = arith.constant 0.000000e+00 : f32
      %30 = vector.broadcast %cst_11 : f32 to vector<1x128xf32>
      %31 = arith.maximumf %29, %30 : vector<1x128xf32>
      %c0_12 = arith.constant 0 : index
      %c0_13 = arith.constant 0 : index
      %32 = vector.load %arg6[%c0_12, %c0_13] : memref<8x128xf32, #tpu.memory_space<vmem>>, vector<1x128xf32>
      %cst_14 = arith.constant 9.99999974E-6 : f32
      %33 = vector.broadcast %cst_14 : f32 to vector<1x128xf32>
      %34 = arith.addf %31, %33 : vector<1x128xf32>
      %35 = math.rsqrt %34 : vector<1x128xf32>
      %36 = arith.mulf %32, %35 : vector<1x128xf32>
      %c1_15 = arith.constant 1 : index
      %c0_16 = arith.constant 0 : index
      %37 = vector.load %arg6[%c1_15, %c0_16] : memref<8x128xf32, #tpu.memory_space<vmem>>, vector<1x128xf32>
      %38 = arith.mulf %24, %36 : vector<1x128xf32>
      %39 = arith.subf %37, %38 : vector<1x128xf32>
      %40 = arith.index_cast %1 : i32 to index
      %c0_17 = arith.constant 0 : index
      %41 = vector.load %arg9[%40, %c0_17] : memref<384x128xf32, #tpu.memory_space<vmem>>, vector<128x128xf32>
      %42 = vector.broadcast %36 : vector<1x128xf32> to vector<128x128xf32>
      %43 = arith.mulf %41, %42 : vector<128x128xf32>
      %44 = vector.broadcast %39 : vector<1x128xf32> to vector<128x128xf32>
      %45 = arith.addf %43, %44 : vector<128x128xf32>
      %cst_18 = arith.constant 0.000000e+00 : f32
      %46 = vector.broadcast %cst_18 : f32 to vector<128x128xf32>
      %47 = arith.maximumf %45, %46 : vector<128x128xf32>
      %48 = arith.truncf %47 : vector<128x128xf32> to vector<128x128xbf16>
      %c0_19 = arith.constant 0 : index
      %c0_20 = arith.constant 0 : index
      %49 = vector.load %arg5[%c0_19, %c0_20] : memref<128x128xbf16, #tpu.memory_space<vmem>>, vector<128x128xbf16>
      %cst_21 = arith.constant dense<0.000000e+00> : vector<128x128xf32>
      %50 = tpu.matmul %48, %49, %cst_21 {dimension_numbers = #tpu.dot_dimension_numbers<[1], [0], [0], [1], [0, 0, 1, 1], [], []>} : vector<128x128xbf16>, vector<128x128xbf16>, vector<128x128xf32> -> vector<128x128xf32>
      %51 = arith.truncf %50 : vector<128x128xf32> to vector<128x128xbf16>
      %52 = arith.index_cast %1 : i32 to index
      %c0_22 = arith.constant 0 : index
      %53 = vector.load %arg8[%52, %c0_22] : memref<384x128xbf16, #tpu.memory_space<vmem>>, vector<128x128xbf16>
      tpu.vector_store %arg8[%52, %c0_22], %51 {strides = array<i32>} : memref<384x128xbf16, #tpu.memory_space<vmem>>, vector<128x128xbf16>,
    } else {
    }
    %c4_i32 = arith.constant 4 : i32
    %19 = arith.cmpi eq, %arg0, %c4_i32 : i32
    %20 = arith.extui %19 : i1 to i32
    %c0_i32_7 = arith.constant 0 : i32
    %21 = arith.cmpi ne, %20, %c0_i32_7 : i32
    scf.if %21 {
      %c2 = arith.constant 2 : index
      %c0 = arith.constant 0 : index
      %22 = vector.load %arg10[%c2, %c0] : memref<4x128xf32, #tpu.memory_space<vmem>>, vector<1x128xf32>
      %cst = arith.constant 0.00333333341 : f32
      %23 = vector.broadcast %cst : f32 to vector<1x128xf32>
      %24 = arith.mulf %22, %23 : vector<1x128xf32>
      %c3 = arith.constant 3 : index
      %c0_8 = arith.constant 0 : index
      %25 = vector.load %arg10[%c3, %c0_8] : memref<4x128xf32, #tpu.memory_space<vmem>>, vector<1x128xf32>
      %cst_9 = arith.constant 0.00333333341 : f32
      %26 = vector.broadcast %cst_9 : f32 to vector<1x128xf32>
      %27 = arith.mulf %25, %26 : vector<1x128xf32>
      %28 = arith.mulf %24, %24 : vector<1x128xf32>
      %29 = arith.subf %27, %28 : vector<1x128xf32>
      %cst_10 = arith.constant 0.000000e+00 : f32
      %30 = vector.broadcast %cst_10 : f32 to vector<1x128xf32>
      %31 = arith.maximumf %29, %30 : vector<1x128xf32>
      %c2_11 = arith.constant 2 : index
      %c0_12 = arith.constant 0 : index
      %32 = vector.load %arg6[%c2_11, %c0_12] : memref<8x128xf32, #tpu.memory_space<vmem>>, vector<1x128xf32>
      %cst_13 = arith.constant 9.99999974E-6 : f32
      %33 = vector.broadcast %cst_13 : f32 to vector<1x128xf32>
      %34 = arith.addf %31, %33 : vector<1x128xf32>
      %35 = math.rsqrt %34 : vector<1x128xf32>
      %36 = arith.mulf %32, %35 : vector<1x128xf32>
      %c3_14 = arith.constant 3 : index
      %c0_15 = arith.constant 0 : index
      %37 = vector.load %arg6[%c3_14, %c0_15] : memref<8x128xf32, #tpu.memory_space<vmem>>, vector<1x128xf32>
      %38 = arith.mulf %24, %36 : vector<1x128xf32>
      %39 = arith.subf %37, %38 : vector<1x128xf32>
      %40 = arith.index_cast %1 : i32 to index
      %c0_16 = arith.constant 0 : index
      %41 = vector.load %arg9[%40, %c0_16] : memref<384x128xf32, #tpu.memory_space<vmem>>, vector<128x128xf32>
      %42 = vector.broadcast %36 : vector<1x128xf32> to vector<128x128xf32>
      %43 = arith.mulf %41, %42 : vector<128x128xf32>
      %44 = vector.broadcast %39 : vector<1x128xf32> to vector<128x128xf32>
      %45 = arith.addf %43, %44 : vector<128x128xf32>
      %c0_17 = arith.constant 0 : index
      %c0_18 = arith.constant 0 : index
      %46 = vector.load %arg2[%c0_17, %c0_18] : memref<128x128xf32, #tpu.memory_space<vmem>>, vector<128x128xf32>
      %47 = arith.addf %45, %46 : vector<128x128xf32>
      %cst_19 = arith.constant 0.000000e+00 : f32
      %48 = vector.broadcast %cst_19 : f32 to vector<128x128xf32>
      %49 = arith.maximumf %47, %48 : vector<128x128xf32>
      %c0_20 = arith.constant 0 : index
      %c0_21 = arith.constant 0 : index
      %50 = vector.load %arg7[%c0_20, %c0_21] : memref<128x128xf32, #tpu.memory_space<vmem>>, vector<128x128xf32>
      tpu.vector_store %arg7[%c0_20, %c0_21], %49 {strides = array<i32>} : memref<128x128xf32, #tpu.memory_space<vmem>>, vector<128x128xf32>,
    } else {
    }
    return
  }
  func.func @transform_0(%arg0: i32, %arg1: i32) -> (i32, i32) {
    %c0_i32 = arith.constant 0 : i32
    %0 = arith.cmpi eq, %arg0, %c0_i32 : i32
    %c4_i32 = arith.constant 4 : i32
    %1 = arith.cmpi eq, %arg0, %c4_i32 : i32
    %2 = arith.ori %0, %1 : i1
    %c0_i32_0 = arith.constant 0 : i32
    %3 = arith.select %2, %arg1, %c0_i32_0 : i32
    %c0_i32_1 = arith.constant 0 : i32
    %c0_i32_2 = arith.constant 0 : i32
    return %3, %c0_i32_1 : i32, i32
  }
  func.func @transform_1(%arg0: i32, %arg1: i32) -> (i32, i32) {
    %c1_i32 = arith.constant 1 : i32
    %0 = arith.cmpi eq, %arg0, %c1_i32 : i32
    %c3_i32 = arith.constant 3 : i32
    %1 = arith.cmpi eq, %arg0, %c3_i32 : i32
    %2 = arith.ori %0, %1 : i1
    %c1_i32_0 = arith.constant 1 : i32
    %3 = arith.cmpi sle, %arg0, %c1_i32_0 : i32
    %c0_i32 = arith.constant 0 : i32
    %c2_i32 = arith.constant 2 : i32
    %4 = arith.select %3, %c0_i32, %c2_i32 : i32
    %5 = arith.select %2, %arg1, %4 : i32
    %c0_i32_1 = arith.constant 0 : i32
    %c0_i32_2 = arith.constant 0 : i32
    return %5, %c0_i32_1 : i32, i32
  }
  func.func @transform_2(%arg0: i32, %arg1: i32) -> (i32, i32) {
    %c0_i32 = arith.constant 0 : i32
    %c0_i32_0 = arith.constant 0 : i32
    %c0_i32_1 = arith.constant 0 : i32
    return %c0_i32, %c0_i32_0 : i32, i32
  }
  func.func @transform_3(%arg0: i32, %arg1: i32) -> (i32, i32) {
    %c0_i32 = arith.constant 0 : i32
    %c0_i32_0 = arith.constant 0 : i32
    %c0_i32_1 = arith.constant 0 : i32
    return %c0_i32, %c0_i32_0 : i32, i32
  }
  func.func @transform_4(%arg0: i32, %arg1: i32) -> (i32, i32) {
    %c0_i32 = arith.constant 0 : i32
    %c0_i32_0 = arith.constant 0 : i32
    %c0_i32_1 = arith.constant 0 : i32
    return %c0_i32, %c0_i32_0 : i32, i32
  }
  func.func @transform_5(%arg0: i32, %arg1: i32) -> (i32, i32) {
    %c4_i32 = arith.constant 4 : i32
    %0 = arith.cmpi eq, %arg0, %c4_i32 : i32
    %c0_i32 = arith.constant 0 : i32
    %1 = arith.select %0, %arg1, %c0_i32 : i32
    %c0_i32_0 = arith.constant 0 : i32
    %c0_i32_1 = arith.constant 0 : i32
    return %1, %c0_i32_0 : i32, i32
  }
}

</mosaic_0001>

<bundles_post_ra>
// kernel: tpu_custom_call.1
= control target key start
LH: loop header
LB: loop body
LE: loop exit
PB: predicated region body
PF: predicated region fallthrough
CT: control target
= control target key end

     0   :  { %s3789_s0 = inlined_call_operand.hbm [shape: f32[384,128], index: 0, kind: input, shape index: {}]   ;;  %s3790_s1 = inlined_call_operand.hbm [shape: bf16[384,384], index: 1, kind: input, shape index: {}]   ;;  %s3791_s2 = inlined_call_operand.hbm [shape: bf16[128,128], index: 2, kind: input, shape index: {}]   ;;  %s3792_s3 = inlined_call_operand.hbm [shape: bf16[128,128], index: 3, kind: input, shape index: {}]   ;;  %s3793_s4 = inlined_call_operand.vmem [shape: f32[8,128], index: 4, kind: input, shape index: {}]   ;;  %s3794_s5 = inlined_call_operand.hbm [shape: f32[384,128], index: 5, kind: output, shape index: {}]  }
   0x1   :  { %3815 = sst [smem:[#allocation27_spill]] %s3791_s2 }
   0x2   :  { %3816 = sst [smem:[#allocation28_spill]] %s3792_s3 }
   0x3   :  { %3817 = sst [smem:[#allocation29_spill]] %s3793_s4 }
   0x4   :  { %3818 = sst [smem:[#allocation30_spill]] %s3794_s5 }
   0x5   :  { %10 = vsyncpa [#allocation6], 0 }
   0x6   :  { %12 = vsyncpa [#allocation6 + $0x1], 0 }
   0x7   :  { %13 = vsyncpa [#allocation9], 0 }
   0x8   :  { %15 = vsyncpa [#allocation9 + $0x1], 0 }
   0x9   :  { %16 = vsyncpa [#allocation12], 0 }
   0xa   :  { %17 = vsyncpa [#allocation7], 0 }
   0xb   :  { %19 = vsyncpa [#allocation7 + $0x1], 0  ;;  %s3106_s18 = smov 0   ;;  %s3108_s19 = smov 0  }
   0xc   :  { %s3110_s20 = smov 0   ;;  %s3112_s21 = smov 0  }
   0xd   :  { %s3114_s22 = smov 0   ;;  %s3116_s23 = smov 0  }
   0xe   :  { %s3118_s24 = smov 0   ;;  %s3120_s25 = smov 0  }
   0xf   :  { %s3122_s26 = smov 0   ;;  %s3124_s27 = smov 0  }
  0x10   :  { %s3126_s28 = smov 0   ;;  %s3128_s29 = smov 0  }
  0x11   :  { %s3130_s30 = smov 0   ;;  %s3132_s6 = smov 0  }
  0x12 LB: > { %3819 = sst [smem:[#allocation19_spill]] %s3008_s18  ;;  %s3173_s7 = sadd.s32 4294967295, %s3060_s6   ;;  %s3060_s6 = sphi %s3132_s6, %s25_s6   ;;  %s3056_s30 = sphi %s3130_s30, %s3882_s30   ;;  %s3052_s29 = sphi %s3128_s29, %s3881_s29   ;;  %s3048_s28 = sphi %s3126_s28, %s3880_s28   ;;  %s3044_s27 = sphi %s3124_s27, %s3879_s27   ;;  %s3040_s26 = sphi %s3122_s26, %s3878_s26   ;;  %s3036_s25 = sphi %s3120_s25, %s3877_s25   ;;  %s3032_s24 = sphi %s3118_s24, %s3876_s24   ;;  %s3028_s23 = sphi %s3116_s23, %s3875_s23   ;;  %s3024_s22 = sphi %s3114_s22, %s3874_s22   ;;  %s3020_s21 = sphi %s3112_s21, %s3873_s21   ;;  %s3016_s20 = sphi %s3110_s20, %s3872_s20   ;;  %s3012_s19 = sphi %s3108_s19, %s3871_s19   ;;  %s3008_s18 = sphi %s3106_s18, %s3869_s18  }
  0x13   : > { %3820 = sst [smem:[#allocation20_spill]] %s3012_s19  ;;  %s2091_s8 = sadd.s32 4294967294, %s3060_s6  }
  0x14   : > { %3821 = sst [smem:[#allocation21_spill]] %s3044_s27  ;;  %p65_p0 = scmp.ne.s32.totalorder %s3036_s25, %s3032_s24 }
  0x15   : > { %3822 = sst [smem:[#allocation22_spill]] %s3048_s28  ;;  %p3800_p1 = scmp.eq.s32.totalorder %s3173_s7, 0 }
  0x16   : > { %3823 = sst [smem:[#allocation23_spill]] %s3173_s7  ;;  %p103_p2 = scmp.ne.s32.totalorder %s3024_s22, %s3020_s21 }
  0x17   : > { %p3182_p3 = por %p3800_p1, %p65_p0  ;;  %p193_p4 = scmp.ne.s32.totalorder %s3016_s20, %s3012_s19 }
  0x18   : > { %p3190_p5 = por %p103_p2, %p3800_p1  ;;  %p194_p6 = scmp.eq.s32.totalorder %s3173_s7, 14 }
  0x19   : > { %s3824_s10 = scalar_select %p3182_p3, 1, 0 }
  0x1a   : > { %s3825_s11 = scalar_select %p3190_p5, 1, 0 }
  0x1b   : > { %p199_p7 = scmp.ne.s32.totalorder %s3012_s19, %s3008_s18  ;;  %p200_p8 = scmp.eq.s32.totalorder %s2091_s8, 14 }
  0x1c   : > { %3826 = sst [smem:[#allocation24_spill]] %s3825_s11  ;;  %p3197_p9 = por %p194_p6, %p193_p4 }
  0x1d   : > { %p2092_p10 = scmp.ge.s32.totalorder %s3060_s6, 1  ;;  %p3202_p11 = por %p200_p8, %p199_p7 }
  0x1e   : > { %s3827_s12 = scalar_select %p3197_p9, 1, 0 }
  0x1f   : > { %s3829_s13 = scalar_select %p3202_p11, 1, 0 }
  0x20   : > { %3828 = sst [smem:[#allocation25_spill]] %s3827_s12  ;;  %p207_p12 = scmp.lt.s32.totalorder %s3060_s6, 16 }
  0x21   : > { %3830 = sst [smem:[#allocation26_spill]] %s3829_s13  ;;  %s3062_s15 = smov [#allocation10]  }
  0x22   : > { %p3207_p13 = pnand %p2092_p10, %p207_p12  ;;  %s219_s16 = sshll.u32 %s3062_s15, 4  ;;  %s220_s16 = int_to_ptr.vmem [resolvable:$true] %s219_s16 }
  0x23   : > { %s3063_s21 = smov [#allocation11]   ;;  %s3833_s2 = sld [smem:[#allocation27_spill]] }
  0x24   : > { %s3831_s14 = scalar_select %p3207_p13, 1, 0 }
  0x25   : > { %p2555_p0 = pneg %p3207_p13  ;;  %s232_s24 = sshll.u32 %s3063_s21, 4  ;;  %s3219_s24 = int_to_ptr.vmem [resolvable:$true] %s232_s24 }
  0x27   : > { %p3215_p2 = pnand %p2555_p0, %p3800_p1 }
  0x29   : > { %s2786_s13 = scalar_lea.hbm %s3833_s2, 1024  ;;  %p2788_p6 = pneg %p3215_p2 }
  0x2a   : > { %p2787_p4 = scmp.ne.s32.totalorder %s3833_s2, %s2786_s13  ;;  %p2793_p10 = scmp.lt.u32.totalorder %s2786_s13, %s3833_s2 }
  0x2c   : > { %p2789_p7 = pnand %p2788_p6, %p2787_p4 }
  0x2e   : > { %p2790_p8 = pneg %p2789_p7 }
  0x30   : > { %p2795_p12 = pnand %p2793_p10, %p2790_p8 }
  0x32   : > { %2798 = shalt.err (!%p2795_p12)
}
  0x33   : > { %s2799_s21 = scalar_lea.vmem %s220_s16, 1024  ;;  %p2807_p9 = scmp.lt.s32.totalorder %s220_s16, %s220_s16 }
  0x34   : > { %p2800_p0 = scmp.ne.s32.totalorder %s220_s16, %s2799_s21  ;;  %p2808_p5 = scmp.lt.s32.totalorder %s2799_s21, %s2799_s21 }
  0x36   : > { %p2802_p1 = pnand %p2800_p0, %p2788_p6  ;;  %p2809_p3 = por %p2808_p5, %p2807_p9 }
  0x38   : > { %p2803_p11 = pneg %p2802_p1 }
  0x3a   : > { %p2810_p13 = pnand %p2809_p3, %p2803_p11 }
  0x3c   : > { %2813 = shalt.err (!%p2810_p13)
}
  0x3d   : > { %s3064_s18 = smov 64   ;;  %s3065_s9 = smov 4  }
  0x3e   : > { %2558 = dma.hbm_to_vmem [thread:$0]  (!%p3215_p2), %s3833_s2, 1024, %s220_s16, [#allocation9], %s3064_s18, %s3064_s18, %s3065_s9  }
  0x3f   : > { %s3834_s3 = sld [smem:[#allocation28_spill]] }
  0x45   : > { %s2814_s15 = scalar_lea.hbm %s3834_s3, 1024 }
  0x46   : > { %p2815_p1 = scmp.ne.s32.totalorder %s3834_s3, %s2814_s15  ;;  %p2821_p9 = scmp.lt.u32.totalorder %s2814_s15, %s3834_s3 }
  0x48   : > { %p2817_p3 = pnand %p2815_p1, %p2788_p6 }
  0x4a   : > { %p2818_p5 = pneg %p2817_p3 }
  0x4c   : > { %p2823_p11 = pnand %p2821_p9, %p2818_p5 }
  0x4e   : > { %2826 = shalt.err (!%p2823_p11)
}
  0x4f   : > { %s2827_s16 = scalar_lea.vmem %s3219_s24, 1024  ;;  %p2835_p8 = scmp.lt.s32.totalorder %s3219_s24, %s3219_s24 }
  0x50   : > { %p2828_p13 = scmp.ne.s32.totalorder %s3219_s24, %s2827_s16  ;;  %p2836_p10 = scmp.lt.s32.totalorder %s2827_s16, %s2827_s16 }
  0x52   : > { %p2830_p4 = pnand %p2828_p13, %p2788_p6  ;;  %p2837_p12 = por %p2836_p10, %p2835_p8 }
  0x54   : > { %p2831_p7 = pneg %p2830_p4 }
  0x56   : > { %p2838_p0 = pnand %p2837_p12, %p2831_p7 }
  0x58   : > { %2841 = shalt.err (!%p2838_p0)
}
  0x59   : > { %2561 = dma.hbm_to_vmem [thread:$0]  (!%p3215_p2), %s3834_s3, 1024, %s3219_s24, [#allocation12], %s3064_s18, %s3064_s18, %s3065_s9  }
  0x5a   : > { %s34_s28 = sadd.s32 1, %s3052_s29  ;;  %s37_s17 = sadd.s32 1, %s3056_s30 }
  0x5b   : > { %p35_p6 = scmp.ge.s32.totalorder %s34_s28, 3  ;;  %p41_p1 = scmp.eq.s32.totalorder %s3056_s30, 0 }
  0x5c   : > { %p42_p3 = scmp.eq.s32.totalorder %s3056_s30, 4  ;;  %s52_s5 = sadd.s32 1, %s3040_s26 }
  0x5d   : > { %s3884_s28 = smov (%p35_p6, %s34_s28), 0  ;;  %s3886_s17 = smov (!%p35_p6, %s37_s17), %s3056_s30 }
  0x5e   : > { %p43_p5 = por %p42_p3, %p41_p1  ;;  %p59_p9 = scmp.ne.s32.totalorder %s3040_s26, %s3036_s25 }
  0x5f   : > { %p39_p11 = scmp.ge.s32.totalorder %s3886_s17, 5  ;;  %p60_p2 = scmp.eq.s32.totalorder %s3060_s6, 0 }
  0x60   : > { %s44_s24 = scalar_select %p43_p5, %s3052_s29, 0 }
  0x61   : > { %s3888_s17 = smov (%p39_p11, %s3886_s17), 0  ;;  %p3286_p13 = por %p60_p2, %p59_p9 }
  0x62   : > { %p3814_p4 = scmp.lt.s32.totalorder %s3060_s6, 15  ;;  %p45_p7 = scmp.eq.s32.totalorder %s3888_s17, 0 }
  0x63   : > { %p46_p8 = scmp.eq.s32.totalorder %s3888_s17, 4  ;;  %s249_s12 = sand.u32 1, %s3040_s26  }
  0x64   : > { %s177_s9 = scalar_select %p42_p3, %s3052_s29, 0 }
  0x65   : > { %p47_p10 = por %p46_p8, %p45_p7  ;;  %s2096_s16 = sshll.u32 %s249_s12, 7 }
  0x66   : > { %s179_s13 = scalar_select %p46_p8, %s3884_s28, 0 }
  0x67   : > { %s48_s8 = scalar_select %p47_p10, %s3884_s28, 0 }
  0x68   : > { %s180_s15 = ssub.s32 %s177_s9, %s179_s13  ;;  %s3836_s4 = sadd.s32 1, %s3016_s20 }
  0x69   : > { %s49_s21 = ssub.s32 %s44_s24, %s48_s8  ;;  %p181_p12 = scmp.eq.s32.totalorder %s180_s15, 0 }
  0x6a   : > { %p50_p0 = scmp.eq.s32.totalorder %s49_s21, 0  ;;  %s2184_s3 = sshll.u32 %s44_s24, 11 }
  0x6b   : > { %s3302_s27 = scalar_select %p181_p12, %s3016_s20, %s3836_s4  }
  0x6c   : > { %s3305_s2 = scalar_select %p50_p0, %s3040_s26, %s52_s5  }
  0x6d   : > { %s3310_s7 = scalar_lea.hbm %s3789_s0, %s2184_s3  ;;  %s253_s9 = scalar_lea.vmem [#allocation5], %s2096_s16 }
  0x6e   : > { %s264_s13 = sshll.u32 %s253_s9, 4  ;;  %p3318_p6 = pnand %p3814_p4, %p3286_p13  ;;  %s3312_s13 = int_to_ptr.vmem [resolvable:$true] %s264_s13 }
  0x6f   : > { %s3322_s5 = scalar_lea.sflag [#allocation6], %s249_s12  ;;  %s2842_s3 = scalar_lea.hbm %s3310_s7, 2048 }
  0x70   : > { %p2843_p1 = scmp.ne.s32.totalorder %s3310_s7, %s2842_s3  ;;  %p2844_p3 = pneg %p3318_p6 }
  0x71   : > { %s2847_s24 = scalar_lea.hbm %s3789_s0, 6144  ;;  %p2848_p11 = scmp.lt.u32.totalorder %s3310_s7, %s3789_s0 }
  0x72   : > { %p2845_p5 = pnand %p2844_p3, %p2843_p1  ;;  %p2849_p13 = scmp.lt.u32.totalorder %s2847_s24, %s2842_s3 }
  0x73   : > { %p2851_p8 = scmp.lt.u32.totalorder %s2842_s3, %s3310_s7 }
  0x74   : > { %p2846_p9 = pneg %p2845_p5  ;;  %p2850_p7 = por %p2849_p13, %p2848_p11 }
  0x76   : > { %p2852_p10 = por %p2851_p8, %p2850_p7 }
  0x78   : > { %p2853_p12 = pnand %p2852_p10, %p2846_p9 }
  0x7a   : > { %2856 = shalt.err (!%p2853_p12)
}
  0x7b   : > { %s2857_s12 = scalar_lea.vmem %s3312_s13, 2048  ;;  %s3066_s21 = smov [#allocation5]  }
  0x7c   : > { %p2858_p0 = scmp.ne.s32.totalorder %s3312_s13, %s2857_s12  ;;  %s2862_s16 = sshll.u32 %s3066_s21, 4  ;;  %s2863_s16 = int_to_ptr.vmem [resolvable:$false] %s2862_s16 }
  0x7d   : > { %s2864_s4 = scalar_lea.vmem %s2863_s16, 4096  ;;  %p2865_p4 = scmp.lt.s32.totalorder %s3312_s13, %s2863_s16 }
  0x7e   : > { %p2860_p1 = pnand %p2858_p0, %p2844_p3  ;;  %p2866_p11 = scmp.lt.s32.totalorder %s2864_s4, %s2857_s12 }
  0x80   : > { %p2861_p5 = pneg %p2860_p1  ;;  %p2867_p13 = por %p2866_p11, %p2865_p4 }
  0x82   : > { %p2868_p7 = pnand %p2867_p13, %p2861_p5 }
  0x84   : > { %2871 = shalt.err (!%p2868_p7)
}
  0x85   : > { %s3067_s9 = smov 128   ;;  %s3068_s3 = smov 8  }
  0x86   : > { %2565 = dma.hbm_to_vmem [thread:$0]  (!%p3318_p6), %s3310_s7, 2048, %s3312_s13, %s3322_s5, %s3067_s9, %s3067_s9, %s3068_s3  }
  0x87   : > { %p75_p4 = scmp.eq.s32.totalorder %s3056_s30, 1  ;;  %p76_p3 = scmp.eq.s32.totalorder %s3056_s30, 3 }
  0x88   : > { %p78_p9 = scmp.le.s32.totalorder %s3056_s30, 1  ;;  %p81_p8 = scmp.eq.s32.totalorder %s3888_s17, 1 }
  0x89   : > { %p82_p10 = scmp.eq.s32.totalorder %s3888_s17, 3  ;;  %p77_p12 = por %p76_p3, %p75_p4 }
  0x8a   : > { %p84_p0 = scmp.le.s32.totalorder %s3888_s17, 1  ;;  %s90_s11 = sadd.s32 1, %s3028_s23 }
  0x8b   : > { %s79_s19 = scalar_select %p78_p9, 0, 2 }
  0x8c   : > { %p83_p1 = por %p82_p10, %p81_p8  ;;  %p97_p5 = scmp.ne.s32.totalorder %s3028_s23, %s3024_s22 }
  0x8d   : > { %s80_s24 = scalar_select %p77_p12, %s3052_s29, %s79_s19 }
  0x8e   : > { %s85_s18 = scalar_select %p84_p0, 0, 2 }
  0x8f   : > { %s274_s8 = sand.u32 1, %s3060_s6   ;;  %p99_p6 = por %p97_p5, %p60_p2 }
  0x90   : > { %s86_s15 = scalar_select %p83_p1, %s3884_s28, %s85_s18 }
  0x91   : > { %s276_s13 = sand.u32 1, %s3028_s23   ;;  %s2539_s12 = smul.u32 3072, %s80_s24 }
  0x92   : > { %s87_s7 = ssub.s32 %s80_s24, %s86_s15  ;;  %s2538_s5 = smul.u32 192, %s276_s13 }
  0x93   : > { %p88_p11 = scmp.eq.s32.totalorder %s87_s7, 0  ;;  %p3838_p13 = scmp.lt.s32.totalorder %s3060_s6, 15 }
  0x94   : > { %s3377_s3 = scalar_lea.hbm %s3790_s1, %s2539_s12  ;;  %s278_s19 = scalar_lea.vmem [#allocation8], %s2538_s5 }
  0x95   : > { %p3367_p7 = pnand %p3838_p13, %p99_p6  ;;  %s292_s24 = sshll.u32 %s278_s19, 4  ;;  %s3379_s24 = int_to_ptr.vmem [resolvable:$true] %s292_s24 }
  0x96   : > { %s3372_s16 = scalar_select %p88_p11, %s3028_s23, %s90_s11  }
  0x97   : > { %s3381_s18 = scalar_lea.sflag [#allocation9], %s274_s8  ;;  %s2872_s15 = scalar_lea.hbm %s3377_s3, 3072 }
  0x98   : > { %p2873_p2 = scmp.ne.s32.totalorder %s3377_s3, %s2872_s15  ;;  %p2874_p4 = pneg %p3367_p7 }
  0x99   : > { %s2877_s13 = scalar_lea.hbm %s3790_s1, 9216  ;;  %p2878_p8 = scmp.lt.u32.totalorder %s3377_s3, %s3790_s1 }
  0x9a   : > { %p2875_p3 = pnand %p2874_p4, %p2873_p2  ;;  %p2879_p10 = scmp.lt.u32.totalorder %s2877_s13, %s2872_s15 }
  0x9b   : > { %p2881_p0 = scmp.lt.u32.totalorder %s2872_s15, %s3377_s3 }
  0x9c   : > { %p2876_p9 = pneg %p2875_p3  ;;  %p2880_p12 = por %p2879_p10, %p2878_p8 }
  0x9e   : > { %p2882_p1 = por %p2881_p0, %p2880_p12 }
  0xa0   : > { %p2883_p5 = pnand %p2882_p1, %p2876_p9 }
  0xa2   : > { %2886 = shalt.err (!%p2883_p5)
}
  0xa3   : > { %s2887_s8 = scalar_lea.vmem %s3379_s24, 3072  ;;  %s3069_s5 = smov [#allocation8]  }
  0xa4   : > { %p2888_p6 = scmp.ne.s32.totalorder %s3379_s24, %s2887_s8  ;;  %s2892_s9 = sshll.u32 %s3069_s5, 4  ;;  %s2893_s9 = int_to_ptr.vmem [resolvable:$false] %s2892_s9 }
  0xa5   : > { %s2894_s19 = scalar_lea.vmem %s2893_s9, 6144  ;;  %p2895_p2 = scmp.lt.s32.totalorder %s3379_s24, %s2893_s9 }
  0xa6   : > { %p2890_p11 = pnand %p2888_p6, %p2874_p4  ;;  %p2896_p3 = scmp.lt.s32.totalorder %s2894_s19, %s2887_s8 }
  0xa8   : > { %p2891_p13 = pneg %p2890_p11  ;;  %p2897_p8 = por %p2896_p3, %p2895_p2 }
  0xaa   : > { %p2898_p10 = pnand %p2897_p8, %p2891_p13 }
  0xac   : > { %2901 = shalt.err (!%p2898_p10)
}
  0xad   : > { %s3070_s15 = smov 192   ;;  %s3071_s11 = smov 12  }
  0xae   : > { %2568 = dma.hbm_to_vmem [thread:$0]  (!%p3367_p7), %s3377_s3, 3072, %s3379_s24, %s3381_s18, %s3070_s15, %s3070_s15, %s3071_s11  }
  0xaf   : > { %p3840_p4 = scmp.ne.s32.totalorder %s3831_s14, 0 }
  0xb0   : > { %s306_s7 = sand.u32 (!%p3840_p4), 1, %s3036_s25   ;;  %p3841_p9 = scmp.ne.s32.totalorder (!%p3840_p4), %s3824_s10, 0 }
  0xb1   : > { %304 = sbr.rel (%p3840_p4) target bundleno = 1510 (0x5e6), region = 40  ;;  %s2103_s13 = sshll.u32 (!%p3840_p4), %s306_s7, 7 }
  0xb2   : > { %s307_s12 = scalar_lea.sflag (!%p3840_p4), [#allocation6], %s306_s7  ;;  %s3412_s4 = scalar_lea.vmem (!%p3840_p4), [#allocation5], %s2103_s13 }
  0xb8   : > { %2987 = dma.done.wait (%p3841_p9), %s307_s12, 2048  }
  0xb9   : > { %2989 = vsyncadd (%p3841_p9), %s307_s12, 4294965248  ;;  %s3842_s8 = sld [smem:[#allocation23_spill]]  ;;  %s3843_s5 = sld [smem:[#allocation24_spill]] }
  0xba   : > { %s317_s3 = sand.u32 1, %s3024_s22  }
  0xbb   : > { %s2540_s24 = smul.u32 192, %s317_s3 }
  0xbd   : > { %s3420_s18 = scalar_lea.vmem [#allocation8], %s2540_s24 }
  0xbf   : > { %s315_s21 = sand.u32 1, %s3842_s8   ;;  %p3844_p7 = scmp.ne.s32.totalorder %s3843_s5, 0 }
  0xc0   : > { %s316_s14 = scalar_lea.sflag [#allocation9], %s315_s21 }
  0xc1   : > { %2991 = dma.done.wait (%p3844_p7), %s316_s14, 3072  }
  0xc2   : > { %2993 = vsyncadd (%p3844_p7), %s316_s14, 4294964224  ;;  %p3845_p12 = scmp.eq.s32.totalorder %s3842_s8, 0 }
  0xc4   : > { %2995 = dma.done.wait (%p3845_p12), [#allocation9], 1024   ;;  %p3846_p0 = pmov %p3845_p12 }
  0xc6   : > { %2997 = vsyncadd (%p3846_p0), [#allocation9], 4294966272  ;;  %p3847_p1 = pmov %p3846_p0 }
  0xc7   : > { %p3848_p5 = pmov %p3846_p0 }
  0xc8   : > { %2999 = dma.done.wait (%p3847_p1), [#allocation12], 1024  }
  0xc9   : > { %3001 = vsyncadd (%p3848_p5), [#allocation12], 4294966272  ;;  %s3849_s10 = sld [smem:[#allocation20_spill]]  ;;  %s3850_s9 = sld [smem:[#allocation21_spill]] }
  0xca   : > { %s3851_s19 = sld [smem:[#allocation22_spill]] }
  0xcf   : > { %s356_s15 = sand.u32 1, %s3849_s10   ;;  %s3436_s11 = sshll.u32 %s3850_s9, 7 }
  0xd0   : > { %s2106_s7 = sshll.u32 %s356_s15, 7  ;;  %p376_p6 = scmp.eq.s32.totalorder %s3851_s19, 0 }
  0xd1   : > { %p377_p11 = scmp.eq.s32.totalorder %s3850_s9, 0  ;;  %s3442_s13 = scalar_lea.vmem [#allocation13], %s2106_s7 }
  0xd3   : > { %p378_p13 = pnand %p377_p11, %p376_p6 }
  0xd4   : > { %v3072_v0 = vmov (!%p378_p13), 0.0  }
  0xd5   : > { %381 = sbr.rel (%p378_p13) target bundleno = 220 (0xdc), region = 60  ;;  %382 = vst [vmem:[#allocation4] sm:$0xf] (!%p378_p13), %v3072_v0 }
  0xdc PF: > { %s3852_s12 = sld [smem:[#allocation22_spill]] }
  0xe2   : > { %p2108_p2 = scmp.ne.s32.totalorder %s3852_s12, 0 }
  0xe3   : > { %v2702_v1 = vld [vmem:[#allocation10] sm:$0xff] (!%p2108_p2)   ;;  %v2703_v2 = vld [vmem:[#allocation10 + $0x8] sm:$0xff] (!%p2108_p2)   ;;  %v2704_v3 = vld [vmem:[#allocation10 + $0x10] sm:$0xff] (!%p2108_p2)   ;;  %s579_s8 = sshra.s32 (!%p2108_p2), %s3436_s11, 4 }
  0xe4   : > { %385 = sbr.rel (%p2108_p2) target bundleno = 486 (0x1e6), region = 64  ;;  %2378 = vmatprep.subr.bf16.mxu0 (!%p2108_p2), %v2702_v1  ;;  %2506 = vmatprep.subr.bf16.mxu1 (!%p2108_p2), %v2702_v1  ;;  %v2705_v4 = vld [vmem:[#allocation10 + $0x18] sm:$0xff] (!%p2108_p2)   ;;  %v386_v5 = vld [vmem:[%s3412_s4] sm:$0xff] (!%p2108_p2)  ;;  %v387_v6 = vld [vmem:[%s3412_s4 + $0x8] sm:$0xff] (!%p2108_p2)  ;;  %s2117_s5 = sshll.u32 (!%p2108_p2), %s579_s8, 3 }
  0xe5   : > { %2379 = vmatpush3.bf16.msra.mxu0 (!%p2108_p2), %v2702_v1  ;;  %2514 = vmatpush3.bf16.msra.mxu1 (!%p2108_p2), %v2702_v1  ;;  %v394_v7 = vld [vmem:[%s3412_s4 + $0x40] sm:$0xff] (!%p2108_p2)  ;;  %v402_v8 = vpack.c.bf16 (!%p2108_p2), %v387_v6, %v386_v5  ;;  %v395_v9 = vld [vmem:[%s3412_s4 + $0x48] sm:$0xff] (!%p2108_p2)  ;;  %v2708_v13 = vld [vmem:[#allocation10 + $0x30] sm:$0xff] (!%p2108_p2)   ;;  %s582_s21 = scalar_lea.vmem (!%p2108_p2), [#allocation2], %s2117_s5 }
  0xe6   : > { %2380 = vmatprep.subr.bf16.mxu0 (!%p2108_p2), %v2703_v2  ;;  %2507 = vmatprep.subr.bf16.mxu1 (!%p2108_p2), %v2703_v2  ;;  %v406_v10 = vpack.c.bf16 (!%p2108_p2), %v395_v9, %v394_v7  ;;  %v2706_v11 = vld [vmem:[#allocation10 + $0x20] sm:$0xff] (!%p2108_p2)   ;;  %v2707_v12 = vld [vmem:[#allocation10 + $0x28] sm:$0xff] (!%p2108_p2)   ;;  %v2709_v14 = vld [vmem:[#allocation10 + $0x38] sm:$0xff] (!%p2108_p2)  }
  0xe7   : > { %2394 = vmatprep.mubr.bf16.mxu0 (!%p2108_p2), %v402_v8  ;;  %v388_v15 = vld [vmem:[%s3412_s4 + $0x10] sm:$0xff] (!%p2108_p2)  ;;  %v389_v16 = vld [vmem:[%s3412_s4 + $0x18] sm:$0xff] (!%p2108_p2)  ;;  %v390_v19 = vld [vmem:[%s3412_s4 + $0x20] sm:$0xff] (!%p2108_p2) }
  0xe8   : > { %2402 = vmatprep.mubr.bf16.mxu1 (!%p2108_p2), %v406_v10  ;;  %v396_v17 = vld [vmem:[%s3412_s4 + $0x50] sm:$0xff] (!%p2108_p2)  ;;  %v397_v18 = vld [vmem:[%s3412_s4 + $0x58] sm:$0xff] (!%p2108_p2)  ;;  %v391_v20 = vld [vmem:[%s3412_s4 + $0x28] sm:$0xff] (!%p2108_p2)  ;;  %v403_v23 = vpack.c.bf16 (!%p2108_p2), %v389_v16, %v388_v15 }
  0xe9   : > { %2381 = vmatpush3.bf16.msra.mxu0 (!%p2108_p2), %v2703_v2  ;;  %2515 = vmatpush3.bf16.msra.mxu1 (!%p2108_p2), %v2703_v2  ;;  %v398_v21 = vld [vmem:[%s3412_s4 + $0x60] sm:$0xff] (!%p2108_p2)  ;;  %v399_v22 = vld [vmem:[%s3412_s4 + $0x68] sm:$0xff] (!%p2108_p2)  ;;  %v407_v24 = vpack.c.bf16 (!%p2108_p2), %v397_v18, %v396_v17  ;;  %v404_v25 = vpack.c.bf16 (!%p2108_p2), %v391_v20, %v390_v19  ;;  %v392_v27 = vld [vmem:[%s3412_s4 + $0x30] sm:$0xff] (!%p2108_p2) }
  0xea   : > { %2382 = vmatprep.subr.bf16.mxu0 (!%p2108_p2), %v2704_v3  ;;  %2508 = vmatprep.subr.bf16.mxu1 (!%p2108_p2), %v2704_v3  ;;  %v408_v26 = vpack.c.bf16 (!%p2108_p2), %v399_v22, %v398_v21  ;;  %v393_v28 = vld [vmem:[%s3412_s4 + $0x38] sm:$0xff] (!%p2108_p2)  ;;  %v400_v29 = vld [vmem:[%s3412_s4 + $0x70] sm:$0xff] (!%p2108_p2) }
  0xeb   : > { %v401_v30 = vld [vmem:[%s3412_s4 + $0x78] sm:$0xff]  ;;  %v405_v31 = vpack.c.bf16 %v393_v28, %v392_v27 }
  0xec   : > { %v409_v32 = vpack.c.bf16 %v401_v30, %v400_v29 }
  0xed   : > { %2383 = vmatpush3.bf16.msra.mxu0 %v2704_v3  ;;  %2516 = vmatpush3.bf16.msra.mxu1 %v2704_v3 }
  0xee   : > { %2384 = vmatprep.subr.bf16.mxu0 %v2705_v4  ;;  %2509 = vmatprep.subr.bf16.mxu1 %v2705_v4 }
  0xf1   : > { %2385 = vmatpush3.bf16.msra.mxu0 %v2705_v4  ;;  %2517 = vmatpush3.bf16.msra.mxu1 %v2705_v4 }
  0xf2   : > { %2386 = vmatprep.subr.bf16.mxu0 %v2706_v11  ;;  %2510 = vmatprep.subr.bf16.mxu1 %v2706_v11 }
  0xf5   : > { %2387 = vmatpush3.bf16.msra.mxu0 %v2706_v11  ;;  %2518 = vmatpush3.bf16.msra.mxu1 %v2706_v11 }
  0xf6   : > { %2388 = vmatprep.subr.bf16.mxu0 %v2707_v12  ;;  %2511 = vmatprep.subr.bf16.mxu1 %v2707_v12 }
  0xf9   : > { %2389 = vmatpush3.bf16.msra.mxu0 %v2707_v12  ;;  %2519 = vmatpush3.bf16.msra.mxu1 %v2707_v12 }
  0xfa   : > { %2390 = vmatprep.subr.bf16.mxu0 %v2708_v13  ;;  %2512 = vmatprep.subr.bf16.mxu1 %v2708_v13 }
  0xfd   : > { %2391 = vmatpush3.bf16.msra.mxu0 %v2708_v13  ;;  %2520 = vmatpush3.bf16.msra.mxu1 %v2708_v13 }
  0xfe   : > { %2392 = vmatprep.subr.bf16.mxu0 %v2709_v14  ;;  %2513 = vmatprep.subr.bf16.mxu1 %v2709_v14 }
 0x101   : > { %2393 = vmatpush3.bf16.msra.mxu0 %v2709_v14  ;;  %2521 = vmatpush3.bf16.msra.mxu1 %v2709_v14 }
 0x104   : > { %2395 = vmatmul.mubr.bf16.vlgmr.msra.gmra.mrb[0].mxu0 %v403_v23  ;;  %2403 = vmatmul.mubr.bf16.vlgmr.msra.gmra.mrb[0].mxu1 %v407_v24 }
 0x105   : > { %2398 = vmatprep.mubr.bf16.mxu0 %v404_v25  ;;  %2406 = vmatprep.mubr.bf16.mxu1 %v408_v26 }
 0x10c   : > { %2399 = vmatmul.mubr.bf16.gmra.mrb[4].mxu0 %v405_v31  ;;  %2407 = vmatmul.mubr.bf16.gmra.mrb[4].mxu1 %v409_v32 }
 0x1d7   : > { %v2396_v33 = vpop.f32.mrb[0].mxu0  ;;  %v2404_v34 = vpop.f32.mrb[0].mxu1 }
 0x1d8   : > { %v508_v35 = vpop.f32.mrb[1].mxu0  ;;  %v540_v36 = vpop.f32.mrb[1].mxu1 }
 0x1d9   : > { %v2397_v37 = vpop.f32.mrb[2].mxu0  ;;  %v2405_v38 = vpop.f32.mrb[2].mxu1 }
 0x1da   : > { %v572_v39 = vpack.c.bf16 %v2397_v37, %v2396_v33  ;;  %v576_v40 = vpack.c.bf16 %v2405_v38, %v2404_v34  ;;  %v511_v41 = vpop.f32.mrb[3].mxu0  ;;  %v543_v42 = vpop.f32.mrb[3].mxu1 }
 0x1db   : > { %v571_v43 = vpack.c.bf16 %v511_v41, %v508_v35  ;;  %v575_v44 = vpack.c.bf16 %v543_v42, %v540_v36 }
 0x1dc   : > { %584 = vst [vmem:[%s582_s21 + $0x8] sm:$0xff] %v572_v39  ;;  %588 = vst [vmem:[%s582_s21 + $0x28] sm:$0xff] %v576_v40 }
 0x1dd   : > { %583 = vst [vmem:[%s582_s21] sm:$0xff] %v571_v43  ;;  %587 = vst [vmem:[%s582_s21 + $0x20] sm:$0xff] %v575_v44 }
 0x1df   : > { %v2400_v45 = vpop.f32.mrb[4].mxu0  ;;  %v2408_v46 = vpop.f32.mrb[4].mxu1 }
 0x1e0   : > { %v524_v47 = vpop.f32.mrb[5].mxu0  ;;  %v556_v48 = vpop.f32.mrb[5].mxu1 }
 0x1e1   : > { %v2401_v49 = vpop.f32.mrb[6].mxu0  ;;  %v2409_v50 = vpop.f32.mrb[6].mxu1 }
 0x1e2   : > { %v574_v51 = vpack.c.bf16 %v2401_v49, %v2400_v45  ;;  %v578_v52 = vpack.c.bf16 %v2409_v50, %v2408_v46  ;;  %v527_v53 = vpop.f32.mrb[7].mxu0  ;;  %v559_v54 = vpop.f32.mrb[7].mxu1 }
 0x1e3   : > { %v573_v55 = vpack.c.bf16 %v527_v53, %v524_v47  ;;  %v577_v56 = vpack.c.bf16 %v559_v54, %v556_v48 }
 0x1e4   : > { %586 = vst [vmem:[%s582_s21 + $0x18] sm:$0xff] %v574_v51  ;;  %590 = vst [vmem:[%s582_s21 + $0x38] sm:$0xff] %v578_v52 }
 0x1e5   : > { %585 = vst [vmem:[%s582_s21 + $0x10] sm:$0xff] %v573_v55  ;;  %589 = vst [vmem:[%s582_s21 + $0x30] sm:$0xff] %v577_v56 }
 0x1e6 PF: > { %s3853_s3 = sld [smem:[#allocation22_spill]] }
 0x1ec   : > { %p2118_p3 = scmp.ne.s32.totalorder %s3853_s3, 1 }
 0x1ed   : > { %v635_v57 = vld [vmem:[#allocation2 + $0x40] sm:$0xff] (!%p2118_p3)  ;;  %v636_v60 = vld [vmem:[#allocation2 + $0x48] sm:$0xff] (!%p2118_p3)  ;;  %v637_v63 = vld [vmem:[#allocation2 + $0x50] sm:$0xff] (!%p2118_p3)  ;;  %s3488_s24 = scalar_lea.vmem (!%p2118_p3), [#allocation3], %s3436_s11 }
 0x1ee   : > { %594 = sbr.rel (%p2118_p3) target bundleno = 820 (0x334), region = 68  ;;  %v627_v58 = vld [vmem:[#allocation2] sm:$0xff] (!%p2118_p3)  ;;  %2202 = vmatprep.subr.bf16.mxu0 (!%p2118_p3), %v635_v57  ;;  %v644_v61 = vld [vmem:[#allocation2 + $0x88] sm:$0xff] (!%p2118_p3)  ;;  %v645_v0 = vld [vmem:[#allocation2 + $0x90] sm:$0xff] (!%p2118_p3) }
 0x1ef   : > { %v643_v59 = vld [vmem:[#allocation2 + $0x80] sm:$0xff] (!%p2118_p3)  ;;  %2203 = vmatpush3.bf16.msra.mxu0 (!%p2118_p3), %v627_v58  ;;  %v628_v62 = vld [vmem:[#allocation2 + $0x8] sm:$0xff] (!%p2118_p3)  ;;  %v629_v1 = vld [vmem:[#allocation2 + $0x10] sm:$0xff] (!%p2118_p3) }
 0x1f0   : > { %2410 = vmatprep.subr.bf16.mxu1 (!%p2118_p3), %v643_v59  ;;  %2204 = vmatprep.subr.bf16.mxu0 (!%p2118_p3), %v636_v60  ;;  %v638_v2 = vld [vmem:[#allocation2 + $0x58] sm:$0xff] (!%p2118_p3)  ;;  %v2712_v4 = vld [vmem:[%s3420_s18 + $0x4] ss:$12 sps:$4 sm:$0xff] (!%p2118_p3)   ;;  %v639_v7 = vld [vmem:[#allocation2 + $0x60] sm:$0xff] (!%p2118_p3) }
 0x1f1   : > { %2411 = vmatpush3.bf16.msra.mxu1 (!%p2118_p3), %v643_v59  ;;  %v646_v3 = vld [vmem:[#allocation2 + $0x98] sm:$0xff] (!%p2118_p3)  ;;  %v647_v8 = vld [vmem:[#allocation2 + $0xa0] sm:$0xff] (!%p2118_p3)  ;;  %811 = vmatprep.mubr.bf16.mxu0 (!%p2118_p3), %v2712_v4  ;;  %v640_v10 = vld [vmem:[#allocation2 + $0x68] sm:$0xff] (!%p2118_p3) }
 0x1f2   : > { %2412 = vmatprep.subr.bf16.mxu1 (!%p2118_p3), %v644_v61  ;;  %v2713_v5 = vld [vmem:[%s3420_s18 + $0x8] ss:$12 sps:$4 sm:$0xff] (!%p2118_p3)   ;;  %v631_v9 = vld [vmem:[#allocation2 + $0x20] sm:$0xff] (!%p2118_p3)  ;;  %v641_v13 = vld [vmem:[#allocation2 + $0x70] sm:$0xff] (!%p2118_p3) }
 0x1f3   : > { %2205 = vmatpush3.bf16.msra.mxu0 (!%p2118_p3), %v628_v62  ;;  %v630_v6 = vld [vmem:[#allocation2 + $0x18] sm:$0xff] (!%p2118_p3)  ;;  %2426 = vmatprep.mubr.bf16.mxu1 (!%p2118_p3), %v2713_v5  ;;  %v648_v11 = vld [vmem:[#allocation2 + $0xa8] sm:$0xff] (!%p2118_p3)  ;;  %v649_v14 = vld [vmem:[#allocation2 + $0xb0] sm:$0xff] (!%p2118_p3) }
 0x1f4   : > { %2206 = vmatprep.subr.bf16.mxu0 (!%p2118_p3), %v637_v63  ;;  %v632_v12 = vld [vmem:[#allocation2 + $0x28] sm:$0xff] (!%p2118_p3)  ;;  %v633_v15 = vld [vmem:[#allocation2 + $0x30] sm:$0xff] (!%p2118_p3)  ;;  %v642_v16 = vld [vmem:[#allocation2 + $0x78] sm:$0xff] (!%p2118_p3) }
 0x1f5   : > { %2413 = vmatpush3.bf16.msra.mxu1 %v644_v61  ;;  %v650_v17 = vld [vmem:[#allocation2 + $0xb8] sm:$0xff]  ;;  %v2710_v19 = vld [vmem:[%s3420_s18] ss:$12 sps:$4 sm:$0xff]   ;;  %v2715_v21 = vld [vmem:[%s3420_s18 + $0x1c] ss:$12 sps:$4 sm:$0xff]  }
 0x1f6   : > { %2414 = vmatprep.subr.bf16.mxu1 %v645_v0  ;;  %v634_v18 = vld [vmem:[#allocation2 + $0x38] sm:$0xff]  ;;  %v2714_v20 = vld [vmem:[%s3420_s18 + $0x20] ss:$12 sps:$4 sm:$0xff]   ;;  %v2722_v24 = vld [vmem:[%s3420_s18 + $0x50] ss:$12 sps:$4 sm:$0xff]  }
 0x1f7   : > { %2207 = vmatpush3.bf16.msra.mxu0 %v629_v1  ;;  %v2721_v22 = vld [vmem:[%s3420_s18 + $0x38] ss:$12 sps:$4 sm:$0xff]   ;;  %v2718_v25 = vld [vmem:[%s3420_s18 + $0x34] ss:$12 sps:$4 sm:$0xff]   ;;  %v2720_v27 = vld [vmem:[%s3420_s18 + $0x30] ss:$12 sps:$4 sm:$0xff]  }
 0x1f8   : > { %2208 = vmatprep.subr.bf16.mxu0 %v638_v2  ;;  %v2717_v23 = vld [vmem:[%s3420_s18 + $0x18] ss:$12 sps:$4 sm:$0xff]   ;;  %v2729_v26 = vld [vmem:[%s3420_s18 + $0x68] ss:$12 sps:$4 sm:$0xff]   ;;  %v2730_v28 = vld [vmem:[%s3420_s18 + $0x80] ss:$12 sps:$4 sm:$0xff]  }
 0x1f9   : > { %2415 = vmatpush3.bf16.msra.mxu1 %v645_v0  ;;  %v2723_v29 = vld [vmem:[%s3420_s18 + $0x4c] ss:$12 sps:$4 sm:$0xff]   ;;  %v2725_v31 = vld [vmem:[%s3420_s18 + $0x48] ss:$12 sps:$4 sm:$0xff]   ;;  %v2738_v32 = vld [vmem:[%s3420_s18 + $0xb0] ss:$12 sps:$4 sm:$0xff]  }
 0x1fa   : > { %2416 = vmatprep.subr.bf16.mxu1 %v646_v3  ;;  %v2737_v30 = vld [vmem:[%s3420_s18 + $0x98] ss:$12 sps:$4 sm:$0xff]   ;;  %v2728_v34 = vld [vmem:[%s3420_s18 + $0x60] ss:$12 sps:$4 sm:$0xff]   ;;  %v2731_v35 = vld [vmem:[%s3420_s18 + $0x7c] ss:$12 sps:$4 sm:$0xff]  }
 0x1fb   : > { %2209 = vmatpush3.bf16.msra.mxu0 %v630_v6  ;;  %v2726_v33 = vld [vmem:[%s3420_s18 + $0x64] ss:$12 sps:$4 sm:$0xff]   ;;  %v2734_v37 = vld [vmem:[%s3420_s18 + $0x94] ss:$12 sps:$4 sm:$0xff]   ;;  %v2739_v39 = vld [vmem:[%s3420_s18 + $0xac] ss:$12 sps:$4 sm:$0xff]  }
 0x1fc   : > { %2210 = vmatprep.subr.bf16.mxu0 %v639_v7  ;;  %v2733_v36 = vld [vmem:[%s3420_s18 + $0x78] ss:$12 sps:$4 sm:$0xff]   ;;  %v2736_v38 = vld [vmem:[%s3420_s18 + $0x90] ss:$12 sps:$4 sm:$0xff]   ;;  %v2741_v40 = vld [vmem:[%s3420_s18 + $0xa8] ss:$12 sps:$4 sm:$0xff]  }
 0x1fd   : > { %2417 = vmatpush3.bf16.msra.mxu1 %v646_v3 }
 0x1fe   : > { %2418 = vmatprep.subr.bf16.mxu1 %v647_v8 }
 0x1ff   : > { %2211 = vmatpush3.bf16.msra.mxu0 %v631_v9 }
 0x200   : > { %2212 = vmatprep.subr.bf16.mxu0 %v640_v10 }
 0x201   : > { %2419 = vmatpush3.bf16.msra.mxu1 %v647_v8 }
 0x202   : > { %2420 = vmatprep.subr.bf16.mxu1 %v648_v11 }
 0x203   : > { %2213 = vmatpush3.bf16.msra.mxu0 %v632_v12 }
 0x204   : > { %2214 = vmatprep.subr.bf16.mxu0 %v641_v13 }
 0x205   : > { %2421 = vmatpush3.bf16.msra.mxu1 %v648_v11 }
 0x206   : > { %2422 = vmatprep.subr.bf16.mxu1 %v649_v14 }
 0x207   : > { %2215 = vmatpush3.bf16.msra.mxu0 %v633_v15 }
 0x208   : > { %2216 = vmatprep.subr.bf16.mxu0 %v642_v16 }
 0x209   : > { %2423 = vmatpush3.bf16.msra.mxu1 %v649_v14 }
 0x20a   : > { %2424 = vmatprep.subr.bf16.mxu1 %v650_v17 }
 0x20b   : > { %2217 = vmatpush3.bf16.msra.mxu0 %v634_v18 }
 0x20d   : > { %2425 = vmatpush3.bf16.msra.mxu1 %v650_v17 }
 0x20e   : > { %812 = vmatmul.mubr.bf16.vlgmr.msra.gmra.mrb[0].mxu0 %v2710_v19 }
 0x20f   : > { %819 = vmatprep.mubr.bf16.mxu0 %v2715_v21 }
 0x210   : > { %2427 = vmatmul.mubr.bf16.vlgmr.msra.gmra.mrb[0].mxu1 %v2714_v20 }
 0x211   : > { %2430 = vmatprep.mubr.bf16.mxu1 %v2721_v22 }
 0x216   : > { %820 = vmatmul.mubr.bf16.gmra.mrb[4].mxu0 %v2717_v23 }
 0x217   : > { %827 = vmatprep.mubr.bf16.mxu0 %v2718_v25 }
 0x218   : > { %2431 = vmatmul.mubr.bf16.gmra.mrb[4].mxu1 %v2722_v24 }
 0x219   : > { %2434 = vmatprep.mubr.bf16.mxu1 %v2729_v26 }
 0x21e   : > { %828 = vmatmul.mubr.bf16.gmra.mrb[8].mxu0 %v2720_v27 }
 0x21f   : > { %835 = vmatprep.mubr.bf16.mxu0 %v2723_v29 }
 0x220   : > { %2435 = vmatmul.mubr.bf16.gmra.mrb[8].mxu1 %v2730_v28 }
 0x221   : > { %2438 = vmatprep.mubr.bf16.mxu1 %v2737_v30 }
 0x226   : > { %836 = vmatmul.mubr.bf16.gmra.mrb[12].mxu0 %v2725_v31 }
 0x227   : > { %843 = vmatprep.mubr.bf16.mxu0 %v2726_v33 }
 0x228   : > { %2439 = vmatmul.mubr.bf16.gmra.mrb[12].mxu1 %v2738_v32 }
 0x22e   : > { %844 = vmatmul.mubr.bf16.gmra.mrb[16].mxu0 %v2728_v34 }
 0x22f   : > { %851 = vmatprep.mubr.bf16.mxu0 %v2731_v35 }
 0x236   : > { %852 = vmatmul.mubr.bf16.gmra.mrb[20].mxu0 %v2733_v36 }
 0x237   : > { %859 = vmatprep.mubr.bf16.mxu0 %v2734_v37 }
 0x23e   : > { %860 = vmatmul.mubr.bf16.gmra.mrb[24].mxu0 %v2736_v38 }
 0x23f   : > { %867 = vmatprep.mubr.bf16.mxu0 %v2739_v39 }
 0x246   : > { %868 = vmatmul.mubr.bf16.gmra.mrb[28].mxu0 %v2741_v40 }
 0x2e1   : > { %v2218_v41 = vpop.f32.mrb[0].mxu0 }
 0x2e2   : > { %v2219_v43 = vpop.f32.mrb[1].mxu0 }
 0x2e3   : > { %v2428_v42 = vpop.f32.mrb[0].mxu1  ;;  %v2220_v45 = vadd.f32 %v2219_v43, %v2218_v41  ;;  %v2221_v46 = vpop.f32.mrb[2].mxu0 }
 0x2e4   : > { %v910_v44 = vpop.f32.mrb[1].mxu1  ;;  %v2222_v48 = vpop.f32.mrb[3].mxu0 }
 0x2e5   : > { %v2429_v47 = vpop.f32.mrb[2].mxu1  ;;  %v2223_v50 = vadd.f32 %v2222_v48, %v2221_v46  ;;  %v911_v51 = vadd.f32 %v2220_v45, %v910_v44 }
 0x2e6   : > { %v913_v49 = vpop.f32.mrb[3].mxu1 }
 0x2e7   : > { %974 = vst [vmem:[%s3488_s24] sm:$0xff] %v911_v51  ;;  %v914_v52 = vadd.f32 %v2223_v50, %v913_v49  ;;  %v1015_v53 = vmul.f32 %v911_v51, %v911_v51 }
 0x2e9   : > { %975 = vst [vmem:[%s3488_s24 + $0x8] sm:$0xff] %v914_v52  ;;  %v991_v54 = vadd.f32 %v914_v52, %v911_v51  ;;  %v1016_v55 = vmul.f32 %v914_v52, %v914_v52  ;;  %v2224_v56 = vpop.f32.mrb[4].mxu0 }
 0x2ea   : > { %v2225_v58 = vpop.f32.mrb[5].mxu0 }
 0x2eb   : > { %v2432_v57 = vpop.f32.mrb[4].mxu1  ;;  %v1031_v60 = vadd.f32 %v1016_v55, %v1015_v53  ;;  %v2226_v61 = vadd.f32 %v2225_v58, %v2224_v56  ;;  %v2227_v62 = vpop.f32.mrb[6].mxu0 }
 0x2ec   : > { %v926_v59 = vpop.f32.mrb[5].mxu1  ;;  %v2228_v0 = vpop.f32.mrb[7].mxu0 }
 0x2ed   : > { %v2433_v63 = vpop.f32.mrb[6].mxu1  ;;  %v919_v2 = vadd.f32 %v2428_v42, %v2226_v61  ;;  %v2229_v3 = vadd.f32 %v2228_v0, %v2227_v62 }
 0x2ee   : > { %v929_v1 = vpop.f32.mrb[7].mxu1 }
 0x2ef   : > { %976 = vst [vmem:[%s3488_s24 + $0x10] sm:$0xff] %v919_v2  ;;  %v992_v4 = vadd.f32 %v991_v54, %v919_v2  ;;  %v1017_v5 = vmul.f32 %v919_v2, %v919_v2  ;;  %v922_v6 = vadd.f32 %v2429_v47, %v2229_v3 }
 0x2f1   : > { %v1032_v7 = vadd.f32 %v1031_v60, %v1017_v5  ;;  %977 = vst [vmem:[%s3488_s24 + $0x18] sm:$0xff] %v922_v6  ;;  %v1018_v8 = vmul.f32 %v922_v6, %v922_v6  ;;  %v2230_v9 = vpop.f32.mrb[8].mxu0  ;;  %v993_v10 = vadd.f32 %v992_v4, %v922_v6 }
 0x2f2   : > { %v2231_v12 = vpop.f32.mrb[9].mxu0 }
 0x2f3   : > { %v2436_v11 = vpop.f32.mrb[8].mxu1  ;;  %v2232_v14 = vadd.f32 %v2231_v12, %v2230_v9  ;;  %v2233_v15 = vpop.f32.mrb[10].mxu0  ;;  %v1033_v16 = vadd.f32 %v1032_v7, %v1018_v8 }
 0x2f4   : > { %v942_v13 = vpop.f32.mrb[9].mxu1  ;;  %v2234_v18 = vpop.f32.mrb[11].mxu0 }
 0x2f5   : > { %v2437_v17 = vpop.f32.mrb[10].mxu1  ;;  %v2235_v20 = vadd.f32 %v2234_v18, %v2233_v15  ;;  %v927_v21 = vadd.f32 %v2232_v14, %v926_v59 }
 0x2f6   : > { %v945_v19 = vpop.f32.mrb[11].mxu1 }
 0x2f7   : > { %978 = vst [vmem:[%s3488_s24 + $0x20] sm:$0xff] %v927_v21  ;;  %v994_v22 = vadd.f32 %v993_v10, %v927_v21  ;;  %v1019_v23 = vmul.f32 %v927_v21, %v927_v21  ;;  %v930_v24 = vadd.f32 %v2235_v20, %v929_v1 }
 0x2f9   : > { %v1034_v25 = vadd.f32 %v1033_v16, %v1019_v23  ;;  %979 = vst [vmem:[%s3488_s24 + $0x28] sm:$0xff] %v930_v24  ;;  %v995_v26 = vadd.f32 %v994_v22, %v930_v24  ;;  %v1020_v27 = vmul.f32 %v930_v24, %v930_v24  ;;  %v2236_v28 = vpop.f32.mrb[12].mxu0 }
 0x2fa   : > { %v2237_v30 = vpop.f32.mrb[13].mxu0 }
 0x2fb   : > { %v3496_v29 = vpop.f32.mrb[12].mxu1  ;;  %v1035_v32 = vadd.f32 %v1034_v25, %v1020_v27  ;;  %v2238_v33 = vadd.f32 %v2237_v30, %v2236_v28  ;;  %v2239_v34 = vpop.f32.mrb[14].mxu0 }
 0x2fc   : > { %v958_v31 = vpop.f32.mrb[13].mxu1  ;;  %v2240_v36 = vpop.f32.mrb[15].mxu0 }
 0x2fd   : > { %v3498_v35 = vpop.f32.mrb[14].mxu1  ;;  %v935_v38 = vadd.f32 %v2432_v57, %v2238_v33  ;;  %v2241_v39 = vadd.f32 %v2240_v36, %v2239_v34 }
 0x2fe   : > { %v961_v37 = vpop.f32.mrb[15].mxu1 }
 0x2ff   : > { %980 = vst [vmem:[%s3488_s24 + $0x30] sm:$0xff] %v935_v38  ;;  %v996_v40 = vadd.f32 %v995_v26, %v935_v38  ;;  %v1021_v41 = vmul.f32 %v935_v38, %v935_v38  ;;  %v938_v42 = vadd.f32 %v2433_v63, %v2241_v39 }
 0x301   : > { %v1036_v43 = vadd.f32 %v1035_v32, %v1021_v41  ;;  %981 = vst [vmem:[%s3488_s24 + $0x38] sm:$0xff] %v938_v42  ;;  %v1022_v44 = vmul.f32 %v938_v42, %v938_v42  ;;  %v2242_v45 = vpop.f32.mrb[16].mxu0  ;;  %v997_v46 = vadd.f32 %v996_v40, %v938_v42 }
 0x302   : > { %v2243_v47 = vpop.f32.mrb[17].mxu0 }
 0x303   : > { %v2244_v48 = vadd.f32 %v2243_v47, %v2242_v45  ;;  %v2245_v49 = vpop.f32.mrb[18].mxu0  ;;  %v1037_v50 = vadd.f32 %v1036_v43, %v1022_v44 }
 0x304   : > { %v2246_v51 = vpop.f32.mrb[19].mxu0 }
 0x305   : > { %v2247_v52 = vadd.f32 %v2246_v51, %v2245_v49  ;;  %v943_v53 = vadd.f32 %v2244_v48, %v942_v13  ;;  %v990_v49 = vld [vmem:[#allocation4] sm:$0x1] }
 0x307   : > { %982 = vst [vmem:[%s3488_s24 + $0x40] sm:$0xff] %v943_v53  ;;  %v998_v54 = vadd.f32 %v997_v46, %v943_v53  ;;  %v1023_v55 = vmul.f32 %v943_v53, %v943_v53  ;;  %v946_v56 = vadd.f32 %v2247_v52, %v945_v19  ;;  %v1014_v52 = vld [vmem:[#allocation4 + $0x1] sm:$0x1] }
 0x309   : > { %v1038_v57 = vadd.f32 %v1037_v50, %v1023_v55  ;;  %983 = vst [vmem:[%s3488_s24 + $0x48] sm:$0xff] %v946_v56  ;;  %v999_v58 = vadd.f32 %v998_v54, %v946_v56  ;;  %v1024_v59 = vmul.f32 %v946_v56, %v946_v56  ;;  %v2248_v60 = vpop.f32.mrb[20].mxu0 }
 0x30a   : > { %v2249_v61 = vpop.f32.mrb[21].mxu0 }
 0x30b   : > { %v1039_v62 = vadd.f32 %v1038_v57, %v1024_v59  ;;  %v2250_v63 = vadd.f32 %v2249_v61, %v2248_v60  ;;  %v2251_v0 = vpop.f32.mrb[22].mxu0 }
 0x30c   : > { %v2252_v1 = vpop.f32.mrb[23].mxu0 }
 0x30d   : > { %v951_v2 = vadd.f32 %v2436_v11, %v2250_v63  ;;  %v2253_v3 = vadd.f32 %v2252_v1, %v2251_v0 }
 0x30f   : > { %984 = vst [vmem:[%s3488_s24 + $0x50] sm:$0xff] %v951_v2  ;;  %v1000_v4 = vadd.f32 %v999_v58, %v951_v2  ;;  %v1025_v5 = vmul.f32 %v951_v2, %v951_v2  ;;  %v954_v6 = vadd.f32 %v2437_v17, %v2253_v3 }
 0x311   : > { %v1040_v7 = vadd.f32 %v1039_v62, %v1025_v5  ;;  %985 = vst [vmem:[%s3488_s24 + $0x58] sm:$0xff] %v954_v6  ;;  %v1026_v8 = vmul.f32 %v954_v6, %v954_v6  ;;  %v2254_v9 = vpop.f32.mrb[24].mxu0  ;;  %v1001_v10 = vadd.f32 %v1000_v4, %v954_v6 }
 0x312   : > { %v2255_v12 = vpop.f32.mrb[25].mxu0 }
 0x313   : > { %v2256_v13 = vadd.f32 %v2255_v12, %v2254_v9  ;;  %v2257_v14 = vpop.f32.mrb[26].mxu0  ;;  %v1041_v15 = vadd.f32 %v1040_v7, %v1026_v8 }
 0x314   : > { %v2258_v16 = vpop.f32.mrb[27].mxu0 }
 0x315   : > { %v2259_v18 = vadd.f32 %v2258_v16, %v2257_v14  ;;  %v959_v19 = vadd.f32 %v2256_v13, %v958_v31 }
 0x317   : > { %986 = vst [vmem:[%s3488_s24 + $0x60] sm:$0xff] %v959_v19  ;;  %v1002_v11 = vadd.f32 %v1001_v10, %v959_v19  ;;  %v1027_v20 = vmul.f32 %v959_v19, %v959_v19  ;;  %v962_v21 = vadd.f32 %v2259_v18, %v961_v37 }
 0x319   : > { %v1042_v22 = vadd.f32 %v1041_v15, %v1027_v20  ;;  %987 = vst [vmem:[%s3488_s24 + $0x68] sm:$0xff] %v962_v21  ;;  %v1003_v17 = vadd.f32 %v1002_v11, %v962_v21  ;;  %v1028_v23 = vmul.f32 %v962_v21, %v962_v21  ;;  %v2260_v24 = vpop.f32.mrb[28].mxu0 }
 0x31a   : > { %v2261_v25 = vpop.f32.mrb[29].mxu0 }
 0x31b   : > { %v1043_v26 = vadd.f32 %v1042_v22, %v1028_v23  ;;  %v2262_v27 = vadd.f32 %v2261_v25, %v2260_v24  ;;  %v2263_v28 = vpop.f32.mrb[30].mxu0 }
 0x31c   : > { %v2264_v30 = vpop.f32.mrb[31].mxu0 }
 0x31d   : > { %v967_v32 = vadd.f32 %v3496_v29, %v2262_v27  ;;  %v2265_v33 = vadd.f32 %v2264_v30, %v2263_v28 }
 0x31f   : > { %988 = vst [vmem:[%s3488_s24 + $0x70] sm:$0xff] %v967_v32  ;;  %v1004_v31 = vadd.f32 %v1003_v17, %v967_v32  ;;  %v1029_v34 = vmul.f32 %v967_v32, %v967_v32  ;;  %v970_v36 = vadd.f32 %v3498_v35, %v2265_v33 }
 0x321   : > { %v1044_v37 = vadd.f32 %v1043_v26, %v1029_v34  ;;  %989 = vst [vmem:[%s3488_s24 + $0x78] sm:$0xff] %v970_v36  ;;  %v1005_v38 = vadd.f32 %v1004_v31, %v970_v36  ;;  %v1030_v39 = vmul.f32 %v970_v36, %v970_v36 }
 0x323   : > { %v1006_v40 = vrot.slane %v1005_v38, 4  ;;  %v1045_v41 = vadd.f32 %v1044_v37, %v1030_v39 }
 0x325   : > { %v1007_v42 = vadd.f32 %v1006_v40, %v1005_v38  ;;  %v1046_v43 = vrot.slane %v1045_v41, 4 }
 0x327   : > { %v1008_v44 = vrot.slane %v1007_v42, 2  ;;  %v1047_v45 = vadd.f32 %v1046_v43, %v1045_v41 }
 0x329   : > { %v1009_v46 = vadd.f32 %v1008_v44, %v1007_v42  ;;  %v1048_v47 = vrot.slane %v1047_v45, 2 }
 0x32b   : > { %v1010_v48 = vrot.slane %v1009_v46, 1  ;;  %v1049_v29 = vadd.f32 %v1048_v47, %v1047_v45 }
 0x32d   : > { %v1011_v50 = vadd.f32 %v1010_v48, %v1009_v46  ;;  %v1050_v51 = vrot.slane %v1049_v29, 1 }
 0x32f   : > { %v1012_v53 = vadd.f32 %v1011_v50, %v990_v49  ;;  %v1051_v35 = vadd.f32 %v1050_v51, %v1049_v29 }
 0x331   : > { %1013 = vst [vmem:[#allocation4] sm:$0x1] %v1012_v53  ;;  %v1052_v54 = vadd.f32 %v1051_v35, %v1014_v52 }
 0x333   : > { %1053 = vst [vmem:[#allocation4 + $0x1] sm:$0x1] %v1052_v54 }
 0x334 PF: > { %s3854_s14 = sld [smem:[#allocation22_spill]] }
 0x33a   : > { %p2143_p8 = scmp.ne.s32.totalorder %s3854_s14, 3 }
 0x33b   : > { %v1098_v55 = vld [vmem:[#allocation2 + $0x40] sm:$0xff] (!%p2143_p8)  ;;  %v1099_v58 = vld [vmem:[#allocation2 + $0x48] sm:$0xff] (!%p2143_p8)  ;;  %v1100_v61 = vld [vmem:[#allocation2 + $0x50] sm:$0xff] (!%p2143_p8)  ;;  %s3538_s10 = scalar_lea.vmem (!%p2143_p8), [#allocation3], %s3436_s11 }
 0x33c   : > { %1057 = sbr.rel (%p2143_p8) target bundleno = 1154 (0x482), region = 72  ;;  %v1090_v56 = vld [vmem:[#allocation2] sm:$0xff] (!%p2143_p8)  ;;  %2282 = vmatprep.subr.bf16.mxu0 (!%p2143_p8), %v1098_v55  ;;  %v1107_v59 = vld [vmem:[#allocation2 + $0x88] sm:$0xff] (!%p2143_p8)  ;;  %v1108_v62 = vld [vmem:[#allocation2 + $0x90] sm:$0xff] (!%p2143_p8) }
 0x33d   : > { %v1106_v57 = vld [vmem:[#allocation2 + $0x80] sm:$0xff] (!%p2143_p8)  ;;  %2283 = vmatpush3.bf16.msra.mxu0 (!%p2143_p8), %v1090_v56  ;;  %v1091_v60 = vld [vmem:[#allocation2 + $0x8] sm:$0xff] (!%p2143_p8)  ;;  %v1092_v63 = vld [vmem:[#allocation2 + $0x10] sm:$0xff] (!%p2143_p8) }
 0x33e   : > { %2442 = vmatprep.subr.bf16.mxu1 (!%p2143_p8), %v1106_v57  ;;  %2284 = vmatprep.subr.bf16.mxu0 (!%p2143_p8), %v1099_v58  ;;  %v1101_v0 = vld [vmem:[#allocation2 + $0x58] sm:$0xff] (!%p2143_p8)  ;;  %v2744_v2 = vld [vmem:[%s3420_s18 + $0x4] ss:$12 sps:$4 sm:$0xff] (!%p2143_p8)   ;;  %v1102_v5 = vld [vmem:[#allocation2 + $0x60] sm:$0xff] (!%p2143_p8) }
 0x33f   : > { %2443 = vmatpush3.bf16.msra.mxu1 (!%p2143_p8), %v1106_v57  ;;  %v1109_v1 = vld [vmem:[#allocation2 + $0x98] sm:$0xff] (!%p2143_p8)  ;;  %v1110_v6 = vld [vmem:[#allocation2 + $0xa0] sm:$0xff] (!%p2143_p8)  ;;  %1274 = vmatprep.mubr.bf16.mxu0 (!%p2143_p8), %v2744_v2  ;;  %v1103_v8 = vld [vmem:[#allocation2 + $0x68] sm:$0xff] (!%p2143_p8) }
 0x340   : > { %2444 = vmatprep.subr.bf16.mxu1 (!%p2143_p8), %v1107_v59  ;;  %v2745_v3 = vld [vmem:[%s3420_s18 + $0x8] ss:$12 sps:$4 sm:$0xff] (!%p2143_p8)   ;;  %v1094_v7 = vld [vmem:[#allocation2 + $0x20] sm:$0xff] (!%p2143_p8)  ;;  %v1104_v12 = vld [vmem:[#allocation2 + $0x70] sm:$0xff] (!%p2143_p8) }
 0x341   : > { %2285 = vmatpush3.bf16.msra.mxu0 (!%p2143_p8), %v1091_v60  ;;  %v1093_v4 = vld [vmem:[#allocation2 + $0x18] sm:$0xff] (!%p2143_p8)  ;;  %2458 = vmatprep.mubr.bf16.mxu1 (!%p2143_p8), %v2745_v3  ;;  %v1111_v9 = vld [vmem:[#allocation2 + $0xa8] sm:$0xff] (!%p2143_p8)  ;;  %v1112_v13 = vld [vmem:[#allocation2 + $0xb0] sm:$0xff] (!%p2143_p8) }
 0x342   : > { %2286 = vmatprep.subr.bf16.mxu0 (!%p2143_p8), %v1100_v61  ;;  %v1095_v10 = vld [vmem:[#allocation2 + $0x28] sm:$0xff] (!%p2143_p8)  ;;  %v1096_v14 = vld [vmem:[#allocation2 + $0x30] sm:$0xff] (!%p2143_p8)  ;;  %v1105_v15 = vld [vmem:[#allocation2 + $0x78] sm:$0xff] (!%p2143_p8) }
 0x343   : > { %2445 = vmatpush3.bf16.msra.mxu1 %v1107_v59  ;;  %v1113_v16 = vld [vmem:[#allocation2 + $0xb8] sm:$0xff]  ;;  %v2742_v19 = vld [vmem:[%s3420_s18] ss:$12 sps:$4 sm:$0xff]   ;;  %v2747_v20 = vld [vmem:[%s3420_s18 + $0x1c] ss:$12 sps:$4 sm:$0xff]  }
 0x344   : > { %2446 = vmatprep.subr.bf16.mxu1 %v1108_v62  ;;  %v1097_v18 = vld [vmem:[#allocation2 + $0x38] sm:$0xff]  ;;  %v2746_v11 = vld [vmem:[%s3420_s18 + $0x20] ss:$12 sps:$4 sm:$0xff]   ;;  %v2754_v17 = vld [vmem:[%s3420_s18 + $0x50] ss:$12 sps:$4 sm:$0xff]  }
 0x345   : > { %2287 = vmatpush3.bf16.msra.mxu0 %v1092_v63  ;;  %v2753_v21 = vld [vmem:[%s3420_s18 + $0x38] ss:$12 sps:$4 sm:$0xff]   ;;  %v2750_v23 = vld [vmem:[%s3420_s18 + $0x34] ss:$12 sps:$4 sm:$0xff]   ;;  %v2752_v25 = vld [vmem:[%s3420_s18 + $0x30] ss:$12 sps:$4 sm:$0xff]  }
 0x346   : > { %2288 = vmatprep.subr.bf16.mxu0 %v1101_v0  ;;  %v2749_v22 = vld [vmem:[%s3420_s18 + $0x18] ss:$12 sps:$4 sm:$0xff]   ;;  %v2761_v24 = vld [vmem:[%s3420_s18 + $0x68] ss:$12 sps:$4 sm:$0xff]   ;;  %v2762_v26 = vld [vmem:[%s3420_s18 + $0x80] ss:$12 sps:$4 sm:$0xff]  }
 0x347   : > { %2447 = vmatpush3.bf16.msra.mxu1 %v1108_v62  ;;  %v2755_v27 = vld [vmem:[%s3420_s18 + $0x4c] ss:$12 sps:$4 sm:$0xff]   ;;  %v2757_v30 = vld [vmem:[%s3420_s18 + $0x48] ss:$12 sps:$4 sm:$0xff]   ;;  %v2770_v32 = vld [vmem:[%s3420_s18 + $0xb0] ss:$12 sps:$4 sm:$0xff]  }
 0x348   : > { %2448 = vmatprep.subr.bf16.mxu1 %v1109_v1  ;;  %v2769_v28 = vld [vmem:[%s3420_s18 + $0x98] ss:$12 sps:$4 sm:$0xff]   ;;  %v2760_v31 = vld [vmem:[%s3420_s18 + $0x60] ss:$12 sps:$4 sm:$0xff]   ;;  %v2763_v34 = vld [vmem:[%s3420_s18 + $0x7c] ss:$12 sps:$4 sm:$0xff]  }
 0x349   : > { %2289 = vmatpush3.bf16.msra.mxu0 %v1093_v4  ;;  %v2758_v33 = vld [vmem:[%s3420_s18 + $0x64] ss:$12 sps:$4 sm:$0xff]   ;;  %v2766_v37 = vld [vmem:[%s3420_s18 + $0x94] ss:$12 sps:$4 sm:$0xff]   ;;  %v2771_v39 = vld [vmem:[%s3420_s18 + $0xac] ss:$12 sps:$4 sm:$0xff]  }
 0x34a   : > { %2290 = vmatprep.subr.bf16.mxu0 %v1102_v5  ;;  %v2765_v36 = vld [vmem:[%s3420_s18 + $0x78] ss:$12 sps:$4 sm:$0xff]   ;;  %v2768_v38 = vld [vmem:[%s3420_s18 + $0x90] ss:$12 sps:$4 sm:$0xff]   ;;  %v2773_v40 = vld [vmem:[%s3420_s18 + $0xa8] ss:$12 sps:$4 sm:$0xff]  }
 0x34b   : > { %2449 = vmatpush3.bf16.msra.mxu1 %v1109_v1 }
 0x34c   : > { %2450 = vmatprep.subr.bf16.mxu1 %v1110_v6 }
 0x34d   : > { %2291 = vmatpush3.bf16.msra.mxu0 %v1094_v7 }
 0x34e   : > { %2292 = vmatprep.subr.bf16.mxu0 %v1103_v8 }
 0x34f   : > { %2451 = vmatpush3.bf16.msra.mxu1 %v1110_v6 }
 0x350   : > { %2452 = vmatprep.subr.bf16.mxu1 %v1111_v9 }
 0x351   : > { %2293 = vmatpush3.bf16.msra.mxu0 %v1095_v10 }
 0x352   : > { %2294 = vmatprep.subr.bf16.mxu0 %v1104_v12 }
 0x353   : > { %2453 = vmatpush3.bf16.msra.mxu1 %v1111_v9 }
 0x354   : > { %2454 = vmatprep.subr.bf16.mxu1 %v1112_v13 }
 0x355   : > { %2295 = vmatpush3.bf16.msra.mxu0 %v1096_v14 }
 0x356   : > { %2296 = vmatprep.subr.bf16.mxu0 %v1105_v15 }
 0x357   : > { %2455 = vmatpush3.bf16.msra.mxu1 %v1112_v13 }
 0x358   : > { %2456 = vmatprep.subr.bf16.mxu1 %v1113_v16 }
 0x359   : > { %2297 = vmatpush3.bf16.msra.mxu0 %v1097_v18 }
 0x35b   : > { %2457 = vmatpush3.bf16.msra.mxu1 %v1113_v16 }
 0x35c   : > { %1275 = vmatmul.mubr.bf16.vlgmr.msra.gmra.mrb[0].mxu0 %v2742_v19 }
 0x35d   : > { %1282 = vmatprep.mubr.bf16.mxu0 %v2747_v20 }
 0x35e   : > { %2459 = vmatmul.mubr.bf16.vlgmr.msra.gmra.mrb[0].mxu1 %v2746_v11 }
 0x35f   : > { %2462 = vmatprep.mubr.bf16.mxu1 %v2753_v21 }
 0x364   : > { %1283 = vmatmul.mubr.bf16.gmra.mrb[4].mxu0 %v2749_v22 }
 0x365   : > { %1290 = vmatprep.mubr.bf16.mxu0 %v2750_v23 }
 0x366   : > { %2463 = vmatmul.mubr.bf16.gmra.mrb[4].mxu1 %v2754_v17 }
 0x367   : > { %2466 = vmatprep.mubr.bf16.mxu1 %v2761_v24 }
 0x36c   : > { %1291 = vmatmul.mubr.bf16.gmra.mrb[8].mxu0 %v2752_v25 }
 0x36d   : > { %1298 = vmatprep.mubr.bf16.mxu0 %v2755_v27 }
 0x36e   : > { %2467 = vmatmul.mubr.bf16.gmra.mrb[8].mxu1 %v2762_v26 }
 0x36f   : > { %2470 = vmatprep.mubr.bf16.mxu1 %v2769_v28 }
 0x374   : > { %1299 = vmatmul.mubr.bf16.gmra.mrb[12].mxu0 %v2757_v30 }
 0x375   : > { %1306 = vmatprep.mubr.bf16.mxu0 %v2758_v33 }
 0x376   : > { %2471 = vmatmul.mubr.bf16.gmra.mrb[12].mxu1 %v2770_v32 }
 0x37c   : > { %1307 = vmatmul.mubr.bf16.gmra.mrb[16].mxu0 %v2760_v31 }
 0x37d   : > { %1314 = vmatprep.mubr.bf16.mxu0 %v2763_v34 }
 0x384   : > { %1315 = vmatmul.mubr.bf16.gmra.mrb[20].mxu0 %v2765_v36 }
 0x385   : > { %1322 = vmatprep.mubr.bf16.mxu0 %v2766_v37 }
 0x38c   : > { %1323 = vmatmul.mubr.bf16.gmra.mrb[24].mxu0 %v2768_v38 }
 0x38d   : > { %1330 = vmatprep.mubr.bf16.mxu0 %v2771_v39 }
 0x394   : > { %1331 = vmatmul.mubr.bf16.gmra.mrb[28].mxu0 %v2773_v40 }
 0x42f   : > { %v2298_v41 = vpop.f32.mrb[0].mxu0 }
 0x430   : > { %v2299_v43 = vpop.f32.mrb[1].mxu0 }
 0x431   : > { %v2460_v42 = vpop.f32.mrb[0].mxu1  ;;  %v2300_v45 = vadd.f32 %v2299_v43, %v2298_v41  ;;  %v2301_v46 = vpop.f32.mrb[2].mxu0 }
 0x432   : > { %v1373_v44 = vpop.f32.mrb[1].mxu1  ;;  %v2302_v48 = vpop.f32.mrb[3].mxu0 }
 0x433   : > { %v2461_v47 = vpop.f32.mrb[2].mxu1  ;;  %v2303_v49 = vadd.f32 %v2302_v48, %v2301_v46  ;;  %v1374_v50 = vadd.f32 %v2300_v45, %v1373_v44 }
 0x434   : > { %v1376_v29 = vpop.f32.mrb[3].mxu1 }
 0x435   : > { %1437 = vst [vmem:[%s3538_s10] sm:$0xff] %v1374_v50  ;;  %v1377_v51 = vadd.f32 %v2303_v49, %v1376_v29  ;;  %v1478_v52 = vmul.f32 %v1374_v50, %v1374_v50 }
 0x437   : > { %1438 = vst [vmem:[%s3538_s10 + $0x8] sm:$0xff] %v1377_v51  ;;  %v1454_v53 = vadd.f32 %v1377_v51, %v1374_v50  ;;  %v1479_v35 = vmul.f32 %v1377_v51, %v1377_v51  ;;  %v2304_v54 = vpop.f32.mrb[4].mxu0 }
 0x438   : > { %v2305_v56 = vpop.f32.mrb[5].mxu0 }
 0x439   : > { %v2464_v55 = vpop.f32.mrb[4].mxu1  ;;  %v1494_v58 = vadd.f32 %v1479_v35, %v1478_v52  ;;  %v2306_v59 = vadd.f32 %v2305_v56, %v2304_v54  ;;  %v2307_v60 = vpop.f32.mrb[6].mxu0 }
 0x43a   : > { %v1389_v57 = vpop.f32.mrb[5].mxu1  ;;  %v2308_v62 = vpop.f32.mrb[7].mxu0 }
 0x43b   : > { %v2465_v61 = vpop.f32.mrb[6].mxu1  ;;  %v1382_v0 = vadd.f32 %v2460_v42, %v2306_v59  ;;  %v2309_v1 = vadd.f32 %v2308_v62, %v2307_v60 }
 0x43c   : > { %v1392_v63 = vpop.f32.mrb[7].mxu1 }
 0x43d   : > { %1439 = vst [vmem:[%s3538_s10 + $0x10] sm:$0xff] %v1382_v0  ;;  %v1455_v2 = vadd.f32 %v1454_v53, %v1382_v0  ;;  %v1480_v3 = vmul.f32 %v1382_v0, %v1382_v0  ;;  %v1385_v4 = vadd.f32 %v2461_v47, %v2309_v1 }
 0x43f   : > { %v1495_v5 = vadd.f32 %v1494_v58, %v1480_v3  ;;  %1440 = vst [vmem:[%s3538_s10 + $0x18] sm:$0xff] %v1385_v4  ;;  %v1481_v6 = vmul.f32 %v1385_v4, %v1385_v4  ;;  %v2310_v7 = vpop.f32.mrb[8].mxu0  ;;  %v1456_v8 = vadd.f32 %v1455_v2, %v1385_v4 }
 0x440   : > { %v2311_v10 = vpop.f32.mrb[9].mxu0 }
 0x441   : > { %v2468_v9 = vpop.f32.mrb[8].mxu1  ;;  %v2312_v13 = vadd.f32 %v2311_v10, %v2310_v7  ;;  %v2313_v14 = vpop.f32.mrb[10].mxu0  ;;  %v1496_v15 = vadd.f32 %v1495_v5, %v1481_v6 }
 0x442   : > { %v1405_v12 = vpop.f32.mrb[9].mxu1  ;;  %v2314_v18 = vpop.f32.mrb[11].mxu0 }
 0x443   : > { %v2469_v16 = vpop.f32.mrb[10].mxu1  ;;  %v2315_v11 = vadd.f32 %v2314_v18, %v2313_v14  ;;  %v1390_v20 = vadd.f32 %v2312_v13, %v1389_v57 }
 0x444   : > { %v1408_v19 = vpop.f32.mrb[11].mxu1 }
 0x445   : > { %1441 = vst [vmem:[%s3538_s10 + $0x20] sm:$0xff] %v1390_v20  ;;  %v1457_v21 = vadd.f32 %v1456_v8, %v1390_v20  ;;  %v1482_v22 = vmul.f32 %v1390_v20, %v1390_v20  ;;  %v1393_v17 = vadd.f32 %v2315_v11, %v1392_v63 }
 0x447   : > { %v1497_v23 = vadd.f32 %v1496_v15, %v1482_v22  ;;  %1442 = vst [vmem:[%s3538_s10 + $0x28] sm:$0xff] %v1393_v17  ;;  %v1458_v24 = vadd.f32 %v1457_v21, %v1393_v17  ;;  %v1483_v25 = vmul.f32 %v1393_v17, %v1393_v17  ;;  %v2316_v26 = vpop.f32.mrb[12].mxu0 }
 0x448   : > { %v2317_v28 = vpop.f32.mrb[13].mxu0 }
 0x449   : > { %v3546_v27 = vpop.f32.mrb[12].mxu1  ;;  %v1498_v32 = vadd.f32 %v1497_v23, %v1483_v25  ;;  %v2318_v33 = vadd.f32 %v2317_v28, %v2316_v26  ;;  %v2319_v31 = vpop.f32.mrb[14].mxu0 }
 0x44a   : > { %v1421_v30 = vpop.f32.mrb[13].mxu1  ;;  %v2320_v36 = vpop.f32.mrb[15].mxu0 }
 0x44b   : > { %v3548_v34 = vpop.f32.mrb[14].mxu1  ;;  %v1398_v38 = vadd.f32 %v2464_v55, %v2318_v33  ;;  %v2321_v39 = vadd.f32 %v2320_v36, %v2319_v31 }
 0x44c   : > { %v1424_v37 = vpop.f32.mrb[15].mxu1 }
 0x44d   : > { %1443 = vst [vmem:[%s3538_s10 + $0x30] sm:$0xff] %v1398_v38  ;;  %v1459_v40 = vadd.f32 %v1458_v24, %v1398_v38  ;;  %v1484_v41 = vmul.f32 %v1398_v38, %v1398_v38  ;;  %v1401_v42 = vadd.f32 %v2465_v61, %v2321_v39 }
 0x44f   : > { %v1499_v43 = vadd.f32 %v1498_v32, %v1484_v41  ;;  %1444 = vst [vmem:[%s3538_s10 + $0x38] sm:$0xff] %v1401_v42  ;;  %v1485_v44 = vmul.f32 %v1401_v42, %v1401_v42  ;;  %v2322_v45 = vpop.f32.mrb[16].mxu0  ;;  %v1460_v46 = vadd.f32 %v1459_v40, %v1401_v42 }
 0x450   : > { %v2323_v47 = vpop.f32.mrb[17].mxu0 }
 0x451   : > { %v2324_v48 = vadd.f32 %v2323_v47, %v2322_v45  ;;  %v2325_v29 = vpop.f32.mrb[18].mxu0  ;;  %v1500_v49 = vadd.f32 %v1499_v43, %v1485_v44 }
 0x452   : > { %v2326_v50 = vpop.f32.mrb[19].mxu0 }
 0x453   : > { %v2327_v51 = vadd.f32 %v2326_v50, %v2325_v29  ;;  %v1406_v52 = vadd.f32 %v2324_v48, %v1405_v12  ;;  %v1453_v29 = vld [vmem:[#allocation4 + $0x2] sm:$0x1] }
 0x455   : > { %1445 = vst [vmem:[%s3538_s10 + $0x40] sm:$0xff] %v1406_v52  ;;  %v1461_v53 = vadd.f32 %v1460_v46, %v1406_v52  ;;  %v1486_v35 = vmul.f32 %v1406_v52, %v1406_v52  ;;  %v1409_v54 = vadd.f32 %v2327_v51, %v1408_v19  ;;  %v1477_v51 = vld [vmem:[#allocation4 + $0x3] sm:$0x1] }
 0x457   : > { %v1501_v55 = vadd.f32 %v1500_v49, %v1486_v35  ;;  %1446 = vst [vmem:[%s3538_s10 + $0x48] sm:$0xff] %v1409_v54  ;;  %v1462_v56 = vadd.f32 %v1461_v53, %v1409_v54  ;;  %v1487_v57 = vmul.f32 %v1409_v54, %v1409_v54  ;;  %v2328_v58 = vpop.f32.mrb[20].mxu0 }
 0x458   : > { %v2329_v59 = vpop.f32.mrb[21].mxu0 }
 0x459   : > { %v1502_v60 = vadd.f32 %v1501_v55, %v1487_v57  ;;  %v2330_v61 = vadd.f32 %v2329_v59, %v2328_v58  ;;  %v2331_v62 = vpop.f32.mrb[22].mxu0 }
 0x45a   : > { %v2332_v63 = vpop.f32.mrb[23].mxu0 }
 0x45b   : > { %v1414_v0 = vadd.f32 %v2468_v9, %v2330_v61  ;;  %v2333_v1 = vadd.f32 %v2332_v63, %v2331_v62 }
 0x45d   : > { %1447 = vst [vmem:[%s3538_s10 + $0x50] sm:$0xff] %v1414_v0  ;;  %v1463_v2 = vadd.f32 %v1462_v56, %v1414_v0  ;;  %v1488_v3 = vmul.f32 %v1414_v0, %v1414_v0  ;;  %v1417_v4 = vadd.f32 %v2469_v16, %v2333_v1 }
 0x45f   : > { %v1503_v5 = vadd.f32 %v1502_v60, %v1488_v3  ;;  %1448 = vst [vmem:[%s3538_s10 + $0x58] sm:$0xff] %v1417_v4  ;;  %v1489_v6 = vmul.f32 %v1417_v4, %v1417_v4  ;;  %v2334_v7 = vpop.f32.mrb[24].mxu0  ;;  %v1464_v8 = vadd.f32 %v1463_v2, %v1417_v4 }
 0x460   : > { %v2335_v10 = vpop.f32.mrb[25].mxu0 }
 0x461   : > { %v2336_v12 = vadd.f32 %v2335_v10, %v2334_v7  ;;  %v2337_v13 = vpop.f32.mrb[26].mxu0  ;;  %v1504_v14 = vadd.f32 %v1503_v5, %v1489_v6 }
 0x462   : > { %v2338_v15 = vpop.f32.mrb[27].mxu0 }
 0x463   : > { %v2339_v18 = vadd.f32 %v2338_v15, %v2337_v13  ;;  %v1422_v19 = vadd.f32 %v2336_v12, %v1421_v30 }
 0x465   : > { %1449 = vst [vmem:[%s3538_s10 + $0x60] sm:$0xff] %v1422_v19  ;;  %v1465_v9 = vadd.f32 %v1464_v8, %v1422_v19  ;;  %v1490_v11 = vmul.f32 %v1422_v19, %v1422_v19  ;;  %v1425_v20 = vadd.f32 %v2339_v18, %v1424_v37 }
 0x467   : > { %v1505_v21 = vadd.f32 %v1504_v14, %v1490_v11  ;;  %1450 = vst [vmem:[%s3538_s10 + $0x68] sm:$0xff] %v1425_v20  ;;  %v1466_v16 = vadd.f32 %v1465_v9, %v1425_v20  ;;  %v1491_v22 = vmul.f32 %v1425_v20, %v1425_v20  ;;  %v2340_v17 = vpop.f32.mrb[28].mxu0 }
 0x468   : > { %v2341_v23 = vpop.f32.mrb[29].mxu0 }
 0x469   : > { %v1506_v24 = vadd.f32 %v1505_v21, %v1491_v22  ;;  %v2342_v25 = vadd.f32 %v2341_v23, %v2340_v17  ;;  %v2343_v26 = vpop.f32.mrb[30].mxu0 }
 0x46a   : > { %v2344_v28 = vpop.f32.mrb[31].mxu0 }
 0x46b   : > { %v1430_v32 = vadd.f32 %v3546_v27, %v2342_v25  ;;  %v2345_v33 = vadd.f32 %v2344_v28, %v2343_v26 }
 0x46d   : > { %1451 = vst [vmem:[%s3538_s10 + $0x70] sm:$0xff] %v1430_v32  ;;  %v1467_v30 = vadd.f32 %v1466_v16, %v1430_v32  ;;  %v1492_v31 = vmul.f32 %v1430_v32, %v1430_v32  ;;  %v1433_v36 = vadd.f32 %v3548_v34, %v2345_v33 }
 0x46f   : > { %v1507_v37 = vadd.f32 %v1506_v24, %v1492_v31  ;;  %1452 = vst [vmem:[%s3538_s10 + $0x78] sm:$0xff] %v1433_v36  ;;  %v1468_v38 = vadd.f32 %v1467_v30, %v1433_v36  ;;  %v1493_v39 = vmul.f32 %v1433_v36, %v1433_v36 }
 0x471   : > { %v1469_v40 = vrot.slane %v1468_v38, 4  ;;  %v1508_v41 = vadd.f32 %v1507_v37, %v1493_v39 }
 0x473   : > { %v1470_v42 = vadd.f32 %v1469_v40, %v1468_v38  ;;  %v1509_v43 = vrot.slane %v1508_v41, 4 }
 0x475   : > { %v1471_v44 = vrot.slane %v1470_v42, 2  ;;  %v1510_v45 = vadd.f32 %v1509_v43, %v1508_v41 }
 0x477   : > { %v1472_v46 = vadd.f32 %v1471_v44, %v1470_v42  ;;  %v1511_v47 = vrot.slane %v1510_v45, 2 }
 0x479   : > { %v1473_v48 = vrot.slane %v1472_v46, 1  ;;  %v1512_v27 = vadd.f32 %v1511_v47, %v1510_v45 }
 0x47b   : > { %v1474_v49 = vadd.f32 %v1473_v48, %v1472_v46  ;;  %v1513_v50 = vrot.slane %v1512_v27, 1 }
 0x47d   : > { %v1475_v52 = vadd.f32 %v1474_v49, %v1453_v29  ;;  %v1514_v34 = vadd.f32 %v1513_v50, %v1512_v27 }
 0x47f   : > { %1476 = vst [vmem:[#allocation4 + $0x2] sm:$0x1] %v1475_v52  ;;  %v1515_v53 = vadd.f32 %v1514_v34, %v1477_v51 }
 0x481   : > { %1516 = vst [vmem:[#allocation4 + $0x3] sm:$0x1] %v1515_v53 }
 0x482 PF: > { %s3855_s18 = sld [smem:[#allocation22_spill]] }
 0x488   : > { %p2168_p10 = scmp.ne.s32.totalorder %s3855_s18, 2 }
 0x489   : > { %v2774_v35 = vld [vmem:[#allocation11] sm:$0xff] (!%p2168_p10)   ;;  %v2775_v54 = vld [vmem:[#allocation11 + $0x8] sm:$0xff] (!%p2168_p10)   ;;  %v2776_v55 = vld [vmem:[#allocation11 + $0x10] sm:$0xff] (!%p2168_p10)   ;;  %v1552_v4 = vlaneseq (!%p2168_p10)  ;;  %s3856_s7 = sld [smem:[#allocation29_spill]] (!%p2168_p10)  ;;  %s3570_s5 = scalar_lea.vmem (!%p2168_p10), [#allocation3], %s3436_s11 }
 0x48a   : > { %1520 = sbr.rel (%p2168_p10) target bundleno = 1427 (0x593), region = 76  ;;  %2474 = vmatprep.subr.bf16.mxu0 (!%p2168_p10), %v2774_v35  ;;  %2522 = vmatprep.subr.bf16.mxu1 (!%p2168_p10), %v2774_v35  ;;  %v2777_v56 = vld [vmem:[#allocation11 + $0x18] sm:$0xff] (!%p2168_p10)   ;;  %v2778_v62 = vld [vmem:[#allocation11 + $0x20] sm:$0xff] (!%p2168_p10)   ;;  %v2779_v1 = vld [vmem:[#allocation11 + $0x28] sm:$0xff] (!%p2168_p10)   ;;  %s1785_s21 = sshra.s32 (!%p2168_p10), %s3436_s11, 4 }
 0x48b   : > { %2475 = vmatpush3.bf16.msra.mxu0 (!%p2168_p10), %v2774_v35  ;;  %2530 = vmatpush3.bf16.msra.mxu1 (!%p2168_p10), %v2774_v35  ;;  %v1521_v57 = vld [vmem:[#allocation4] sm:$0x1] (!%p2168_p10)  ;;  %v1523_v58 = vld [vmem:[#allocation4 + $0x1] sm:$0x1] (!%p2168_p10)  ;;  %v2780_v3 = vld [vmem:[#allocation11 + $0x30] sm:$0xff] (!%p2168_p10)   ;;  %v1553_v6 = vshrl.u32 (!%p2168_p10), %v1552_v4, 7 }
 0x48c   : > { %2476 = vmatprep.subr.bf16.mxu0 (!%p2168_p10), %v2775_v54  ;;  %2523 = vmatprep.subr.bf16.mxu1 (!%p2168_p10), %v2775_v54  ;;  %v1522_v59 = vmul.f32 (!%p2168_p10), 0.0033333334, %v1521_v57  ;;  %v1524_v60 = vmul.f32 (!%p2168_p10), 0.0033333334, %v1523_v58  ;;  %v2781_v5 = vld [vmem:[#allocation11 + $0x38] sm:$0xff] (!%p2168_p10)   ;;  %v1537_v15 = vld [vmem:[%s3570_s5 + $0x8] sm:$0xff] (!%p2168_p10) }
 0x48d   : > { %v1554_v8 = vsub.s32 (!%p2168_p10), 0, %v1553_v6  ;;  %v1536_v14 = vld [vmem:[%s3570_s5] sm:$0xff] (!%p2168_p10)  ;;  %v1545_v19 = vld [vmem:[%s3570_s5 + $0x48] sm:$0xff] (!%p2168_p10)  ;;  %v1538_v9 = vld [vmem:[%s3570_s5 + $0x10] sm:$0xff] (!%p2168_p10)  ;;  %s2177_s3 = sshll.u32 (!%p2168_p10), %s1785_s21, 3 }
 0x48e   : > { %v1525_v61 = vmul.f32 (!%p2168_p10), %v1522_v59, %v1522_v59  ;;  %v1544_v18 = vld [vmem:[%s3570_s5 + $0x40] sm:$0xff] (!%p2168_p10)  ;;  %v1539_v21 = vld [vmem:[%s3570_s5 + $0x18] sm:$0xff] (!%p2168_p10)  ;;  %v1546_v16 = vld [vmem:[%s3570_s5 + $0x50] sm:$0xff] (!%p2168_p10)  ;;  %s1788_s24 = scalar_lea.vmem (!%p2168_p10), [#allocation2], %s2177_s3 }
 0x48f   : > { %2477 = vmatpush3.bf16.msra.mxu0 (!%p2168_p10), %v2775_v54  ;;  %2531 = vmatpush3.bf16.msra.mxu1 (!%p2168_p10), %v2775_v54  ;;  %v1528_v7 = vld [vmem:[%s3856_s7] sm:$0x1] (!%p2168_p10)  ;;  %v1532_v13 = vld [vmem:[%s3856_s7 + $0x1] sm:$0x1] (!%p2168_p10)  ;;  %v1547_v22 = vld [vmem:[%s3570_s5 + $0x58] sm:$0xff] (!%p2168_p10) }
 0x490   : > { %2478 = vmatprep.subr.bf16.mxu0 (!%p2168_p10), %v2776_v55  ;;  %2524 = vmatprep.subr.bf16.mxu1 (!%p2168_p10), %v2776_v55  ;;  %v1526_v63 = vsub.f32 (!%p2168_p10), %v1524_v60, %v1525_v61  ;;  %v1540_v17 = vld [vmem:[%s3570_s5 + $0x20] sm:$0xff] (!%p2168_p10)  ;;  %v1541_v23 = vld [vmem:[%s3570_s5 + $0x28] sm:$0xff] (!%p2168_p10)  ;;  %v1542_v30 = vld [vmem:[%s3570_s5 + $0x30] sm:$0xff] (!%p2168_p10) }
 0x491   : > { %v1548_v24 = vld [vmem:[%s3570_s5 + $0x60] sm:$0xff]  ;;  %v1549_v33 = vld [vmem:[%s3570_s5 + $0x68] sm:$0xff]  ;;  %v1543_v31 = vld [vmem:[%s3570_s5 + $0x38] sm:$0xff] }
 0x492   : > { %v1527_v0 = vmax.f32 %v1526_v63, 0.0 }
 0x493   : > { %2479 = vmatpush3.bf16.msra.mxu0 %v2776_v55  ;;  %2532 = vmatpush3.bf16.msra.mxu1 %v2776_v55 }
 0x494   : > { %2480 = vmatprep.subr.bf16.mxu0 %v2777_v56  ;;  %2525 = vmatprep.subr.bf16.mxu1 %v2777_v56  ;;  %v1529_v2 = vadd.f32 1e-05, %v1527_v0  ;;  %v1550_v0 = vld [vmem:[%s3570_s5 + $0x70] sm:$0xff] }
 0x496   : > { %2782 = vrsqrt.f32 %v1529_v2 }
 0x497   : > { %2481 = vmatpush3.bf16.msra.mxu0 %v2777_v56  ;;  %2533 = vmatpush3.bf16.msra.mxu1 %v2777_v56 }
 0x498   : > { %2482 = vmatprep.subr.bf16.mxu0 %v2778_v62  ;;  %2526 = vmatprep.subr.bf16.mxu1 %v2778_v62 }
 0x49b   : > { %2483 = vmatpush3.bf16.msra.mxu0 %v2778_v62  ;;  %2534 = vmatpush3.bf16.msra.mxu1 %v2778_v62 }
 0x49c   : > { %2484 = vmatprep.subr.bf16.mxu0 %v2779_v1  ;;  %2527 = vmatprep.subr.bf16.mxu1 %v2779_v1 }
 0x49f   : > { %2485 = vmatpush3.bf16.msra.mxu0 %v2779_v1  ;;  %2535 = vmatpush3.bf16.msra.mxu1 %v2779_v1  ;;  %v1551_v1 = vld [vmem:[%s3570_s5 + $0x78] sm:$0xff] }
 0x4a0   : > { %2486 = vmatprep.subr.bf16.mxu0 %v2780_v3  ;;  %2528 = vmatprep.subr.bf16.mxu1 %v2780_v3  ;;  %v2783_v10 = vpop.eup %2782 }
 0x4a1   : > { %v1531_v12 = vmul.f32 %v2783_v10, %v1528_v7 }
 0x4a3   : > { %2487 = vmatpush3.bf16.msra.mxu0 %v2780_v3  ;;  %2536 = vmatpush3.bf16.msra.mxu1 %v2780_v3  ;;  %v1533_v11 = vmul.f32 %v1531_v12, %v1522_v59  ;;  %v3577_v20 = vrot.slane %v1531_v12, %v1554_v8 }
 0x4a4   : > { %2488 = vmatprep.subr.bf16.mxu0 %v2781_v5  ;;  %2529 = vmatprep.subr.bf16.mxu1 %v2781_v5 }
 0x4a5   : > { %v1534_v25 = vsub.f32 %v1532_v13, %v1533_v11  ;;  %v1556_v26 = vmul.f32 %v3577_v20, %v1536_v14  ;;  %v1557_v28 = vmul.f32 %v3577_v20, %v1537_v15  ;;  %v1564_v32 = vmul.f32 %v3577_v20, %v1544_v18 }
 0x4a6   : > { %v1565_v36 = vmul.f32 %v3577_v20, %v1545_v19  ;;  %v1558_v37 = vmul.f32 %v3577_v20, %v1538_v9  ;;  %v1559_v38 = vmul.f32 %v3577_v20, %v1539_v21  ;;  %v1566_v39 = vmul.f32 %v3577_v20, %v1546_v16 }
 0x4a7   : > { %2489 = vmatpush3.bf16.msra.mxu0 %v2781_v5  ;;  %2537 = vmatpush3.bf16.msra.mxu1 %v2781_v5  ;;  %v1575_v40 = vrot.slane %v1534_v25, %v1554_v8  ;;  %v1567_v41 = vmul.f32 %v3577_v20, %v1547_v22  ;;  %v1560_v42 = vmul.f32 %v3577_v20, %v1540_v17 }
 0x4a8   : > { %v1561_v43 = vmul.f32 %v3577_v20, %v1541_v23  ;;  %v1568_v44 = vmul.f32 %v3577_v20, %v1548_v24  ;;  %v1569_v45 = vmul.f32 %v3577_v20, %v1549_v33  ;;  %v1562_v46 = vmul.f32 %v3577_v20, %v1542_v30 }
 0x4a9   : > { %v1563_v47 = vmul.f32 %v3577_v20, %v1543_v31  ;;  %v1576_v48 = vadd.f32 %v1575_v40, %v1556_v26  ;;  %v1577_v27 = vadd.f32 %v1575_v40, %v1557_v28  ;;  %v1584_v29 = vadd.f32 %v1575_v40, %v1564_v32 }
 0x4aa   : > { %v1585_v49 = vadd.f32 %v1575_v40, %v1565_v36  ;;  %v1578_v50 = vadd.f32 %v1575_v40, %v1558_v37  ;;  %v1579_v51 = vadd.f32 %v1575_v40, %v1559_v38  ;;  %v1586_v52 = vadd.f32 %v1575_v40, %v1566_v39 }
 0x4ab   : > { %v1587_v34 = vadd.f32 %v1575_v40, %v1567_v41  ;;  %v1592_v53 = vmax.f32 %v1576_v48, 0.0  ;;  %v1593_v35 = vmax.f32 %v1577_v27, 0.0  ;;  %v1600_v54 = vmax.f32 %v1584_v29, 0.0 }
 0x4ac   : > { %v1601_v55 = vmax.f32 %v1585_v49, 0.0  ;;  %v1594_v56 = vmax.f32 %v1578_v50, 0.0  ;;  %v1595_v57 = vmax.f32 %v1579_v51, 0.0  ;;  %v1602_v58 = vmax.f32 %v1586_v52, 0.0 }
 0x4ad   : > { %v1603_v59 = vmax.f32 %v1587_v34, 0.0  ;;  %v1608_v60 = vpack.c.bf16 %v1593_v35, %v1592_v53  ;;  %v1580_v62 = vadd.f32 %v1575_v40, %v1560_v42  ;;  %v1581_v63 = vadd.f32 %v1575_v40, %v1561_v43 }
 0x4ae   : > { %v1612_v61 = vpack.c.bf16 %v1601_v55, %v1600_v54  ;;  %v1609_v2 = vpack.c.bf16 %v1595_v57, %v1594_v56  ;;  %v1588_v4 = vadd.f32 %v1575_v40, %v1568_v44  ;;  %v1589_v5 = vadd.f32 %v1575_v40, %v1569_v45 }
 0x4af   : > { %v1613_v3 = vpack.c.bf16 %v1603_v59, %v1602_v58  ;;  %2490 = vmatprep.mubr.bf16.mxu0 %v1608_v60  ;;  %v1596_v6 = vmax.f32 %v1580_v62, 0.0  ;;  %v1597_v7 = vmax.f32 %v1581_v63, 0.0  ;;  %v1582_v8 = vadd.f32 %v1575_v40, %v1562_v46 }
 0x4b0   : > { %2498 = vmatprep.mubr.bf16.mxu1 %v1612_v61  ;;  %v1583_v10 = vadd.f32 %v1575_v40, %v1563_v47  ;;  %2491 = vmatmul.mubr.bf16.vlgmr.msra.gmra.mrb[0].mxu0 %v1609_v2  ;;  %v1604_v12 = vmax.f32 %v1588_v4, 0.0  ;;  %v1605_v13 = vmax.f32 %v1589_v5, 0.0  ;;  %v1570_v14 = vmul.f32 %v3577_v20, %v1550_v0 }
 0x4b1   : > { %2499 = vmatmul.mubr.bf16.vlgmr.msra.gmra.mrb[0].mxu1 %v1613_v3  ;;  %v1571_v15 = vmul.f32 %v3577_v20, %v1551_v1  ;;  %v1610_v18 = vpack.c.bf16 %v1597_v7, %v1596_v6  ;;  %v1598_v19 = vmax.f32 %v1582_v8, 0.0 }
 0x4b2   : > { %v1599_v9 = vmax.f32 %v1583_v10, 0.0  ;;  %v1614_v11 = vpack.c.bf16 %v1605_v13, %v1604_v12  ;;  %v1590_v21 = vadd.f32 %v1575_v40, %v1570_v14 }
 0x4b3   : > { %v1591_v16 = vadd.f32 %v1575_v40, %v1571_v15  ;;  %2494 = vmatprep.mubr.bf16.mxu0 %v1610_v18 }
 0x4b4   : > { %2502 = vmatprep.mubr.bf16.mxu1 %v1614_v11  ;;  %v1611_v22 = vpack.c.bf16 %v1599_v9, %v1598_v19  ;;  %v1606_v17 = vmax.f32 %v1590_v21, 0.0 }
 0x4b5   : > { %v1607_v23 = vmax.f32 %v1591_v16, 0.0 }
 0x4b7   : > { %v1615_v24 = vpack.c.bf16 %v1607_v23, %v1606_v17 }
 0x4b8   : > { %2495 = vmatmul.mubr.bf16.gmra.mrb[4].mxu0 %v1611_v22 }
 0x4b9   : > { %2503 = vmatmul.mubr.bf16.gmra.mrb[4].mxu1 %v1615_v24 }
 0x583   : > { %v2492_v25 = vpop.f32.mrb[0].mxu0 }
 0x584   : > { %v2500_v26 = vpop.f32.mrb[0].mxu1  ;;  %v1714_v28 = vpop.f32.mrb[1].mxu0 }
 0x585   : > { %v1746_v20 = vpop.f32.mrb[1].mxu1  ;;  %v2493_v32 = vpop.f32.mrb[2].mxu0 }
 0x586   : > { %v2501_v33 = vpop.f32.mrb[2].mxu1  ;;  %v1778_v30 = vpack.c.bf16 %v2493_v32, %v2492_v25  ;;  %v1717_v36 = vpop.f32.mrb[3].mxu0 }
 0x587   : > { %v1782_v31 = vpack.c.bf16 %v2501_v33, %v2500_v26  ;;  %v1749_v37 = vpop.f32.mrb[3].mxu1  ;;  %v1777_v38 = vpack.c.bf16 %v1717_v36, %v1714_v28 }
 0x588   : > { %v1781_v39 = vpack.c.bf16 %v1749_v37, %v1746_v20  ;;  %1790 = vst [vmem:[%s1788_s24 + $0x8] sm:$0xff] %v1778_v30 }
 0x589   : > { %1794 = vst [vmem:[%s1788_s24 + $0x28] sm:$0xff] %v1782_v31  ;;  %1789 = vst [vmem:[%s1788_s24] sm:$0xff] %v1777_v38 }
 0x58a   : > { %1793 = vst [vmem:[%s1788_s24 + $0x20] sm:$0xff] %v1781_v39 }
 0x58b   : > { %v2496_v40 = vpop.f32.mrb[4].mxu0 }
 0x58c   : > { %v2504_v41 = vpop.f32.mrb[4].mxu1  ;;  %v1730_v42 = vpop.f32.mrb[5].mxu0 }
 0x58d   : > { %v1762_v43 = vpop.f32.mrb[5].mxu1  ;;  %v2497_v44 = vpop.f32.mrb[6].mxu0 }
 0x58e   : > { %v2505_v45 = vpop.f32.mrb[6].mxu1  ;;  %v1780_v46 = vpack.c.bf16 %v2497_v44, %v2496_v40  ;;  %v1733_v48 = vpop.f32.mrb[7].mxu0 }
 0x58f   : > { %v1784_v47 = vpack.c.bf16 %v2505_v45, %v2504_v41  ;;  %v1765_v27 = vpop.f32.mrb[7].mxu1  ;;  %v1779_v29 = vpack.c.bf16 %v1733_v48, %v1730_v42 }
 0x590   : > { %v1783_v49 = vpack.c.bf16 %v1765_v27, %v1762_v43  ;;  %1792 = vst [vmem:[%s1788_s24 + $0x18] sm:$0xff] %v1780_v46 }
 0x591   : > { %1796 = vst [vmem:[%s1788_s24 + $0x38] sm:$0xff] %v1784_v47  ;;  %1791 = vst [vmem:[%s1788_s24 + $0x10] sm:$0xff] %v1779_v29 }
 0x592   : > { %1795 = vst [vmem:[%s1788_s24 + $0x30] sm:$0xff] %v1783_v49 }
 0x593 PF: > { %s3857_s14 = sld [smem:[#allocation22_spill]] }
 0x599   : > { %p2178_p4 = scmp.ne.s32.totalorder %s3857_s14, 4 }
 0x59a   : > { %v1801_v50 = vld [vmem:[#allocation4 + $0x2] sm:$0x1] (!%p2178_p4)  ;;  %v1803_v51 = vld [vmem:[#allocation4 + $0x3] sm:$0x1] (!%p2178_p4)  ;;  %v1832_v56 = vlaneseq (!%p2178_p4)  ;;  %s3858_s9 = sld [smem:[#allocation29_spill]] (!%p2178_p4)  ;;  %s3615_s12 = scalar_lea.vmem (!%p2178_p4), [#allocation3], %s3436_s11 }
 0x59b   : > { %1800 = sbr.rel (%p2178_p4) target bundleno = 1481 (0x5c9), region = 80  ;;  %v1802_v52 = vmul.f32 (!%p2178_p4), 0.0033333334, %v1801_v50  ;;  %v1804_v34 = vmul.f32 (!%p2178_p4), 0.0033333334, %v1803_v51  ;;  %v1816_v63 = vld [vmem:[%s3615_s12] sm:$0xff] (!%p2178_p4) }
 0x59c   : > { %v1833_v57 = vshrl.u32 (!%p2178_p4), %v1832_v56, 7  ;;  %v1817_v0 = vld [vmem:[%s3615_s12 + $0x8] sm:$0xff] (!%p2178_p4)  ;;  %v1818_v1 = vld [vmem:[%s3615_s12 + $0x10] sm:$0xff] (!%p2178_p4)  ;;  %v1819_v2 = vld [vmem:[%s3615_s12 + $0x18] sm:$0xff] (!%p2178_p4) }
 0x59d   : > { %v1805_v53 = vmul.f32 (!%p2178_p4), %v1802_v52, %v1802_v52  ;;  %v1820_v3 = vld [vmem:[%s3615_s12 + $0x20] sm:$0xff] (!%p2178_p4)  ;;  %v1821_v6 = vld [vmem:[%s3615_s12 + $0x28] sm:$0xff] (!%p2178_p4)  ;;  %v1822_v7 = vld [vmem:[%s3615_s12 + $0x30] sm:$0xff] (!%p2178_p4) }
 0x59e   : > { %v1834_v59 = vsub.s32 (!%p2178_p4), 0, %v1833_v57  ;;  %v1823_v8 = vld [vmem:[%s3615_s12 + $0x38] sm:$0xff] (!%p2178_p4)  ;;  %v1824_v10 = vld [vmem:[%s3615_s12 + $0x40] sm:$0xff] (!%p2178_p4)  ;;  %v1825_v12 = vld [vmem:[%s3615_s12 + $0x48] sm:$0xff] (!%p2178_p4) }
 0x59f   : > { %v1806_v35 = vsub.f32 (!%p2178_p4), %v1804_v34, %v1805_v53  ;;  %v1826_v13 = vld [vmem:[%s3615_s12 + $0x50] sm:$0xff] (!%p2178_p4)  ;;  %v1827_v9 = vld [vmem:[%s3615_s12 + $0x58] sm:$0xff] (!%p2178_p4)  ;;  %v1828_v11 = vld [vmem:[%s3615_s12 + $0x60] sm:$0xff] (!%p2178_p4) }
 0x5a0   : > { %v1808_v58 = vld [vmem:[%s3858_s9 + $0x2] sm:$0x1] (!%p2178_p4)  ;;  %v1812_v62 = vld [vmem:[%s3858_s9 + $0x3] sm:$0x1] (!%p2178_p4)  ;;  %v1829_v21 = vld [vmem:[%s3615_s12 + $0x68] sm:$0xff] (!%p2178_p4) }
 0x5a1   : > { %v1807_v54 = vmax.f32 (!%p2178_p4), %v1806_v35, 0.0  ;;  %v1872_v25 = vld [vmem:[%s3412_s4] sm:$0xff] (!%p2178_p4)  ;;  %v1873_v26 = vld [vmem:[%s3412_s4 + $0x8] sm:$0xff] (!%p2178_p4)  ;;  %v1874_v33 = vld [vmem:[%s3412_s4 + $0x10] sm:$0xff] (!%p2178_p4) }
 0x5a2   : > { %v1875_v30 = vld [vmem:[%s3412_s4 + $0x18] sm:$0xff]  ;;  %v1876_v31 = vld [vmem:[%s3412_s4 + $0x20] sm:$0xff]  ;;  %v1877_v44 = vld [vmem:[%s3412_s4 + $0x28] sm:$0xff] }
 0x5a3   : > { %v1809_v55 = vadd.f32 1e-05, %v1807_v54  ;;  %v1878_v45 = vld [vmem:[%s3412_s4 + $0x30] sm:$0xff]  ;;  %v1879_v46 = vld [vmem:[%s3412_s4 + $0x38] sm:$0xff]  ;;  %v1881_v56 = vld [vmem:[%s3412_s4 + $0x48] sm:$0xff] }
 0x5a5   : > { %2784 = vrsqrt.f32 %v1809_v55  ;;  %v1880_v55 = vld [vmem:[%s3412_s4 + $0x40] sm:$0xff] }
 0x5af   : > { %v2785_v60 = vpop.eup %2784 }
 0x5b0   : > { %v1811_v61 = vmul.f32 %v2785_v60, %v1808_v58 }
 0x5b2   : > { %v1813_v4 = vmul.f32 %v1811_v61, %v1802_v52  ;;  %v3622_v5 = vrot.slane %v1811_v61, %v1834_v59  ;;  %v1830_v61 = vld [vmem:[%s3615_s12 + $0x70] sm:$0xff] }
 0x5b4   : > { %v1814_v14 = vsub.f32 %v1812_v62, %v1813_v4  ;;  %v1836_v15 = vmul.f32 %v3622_v5, %v1816_v63  ;;  %v1837_v18 = vmul.f32 %v3622_v5, %v1817_v0  ;;  %v1838_v19 = vmul.f32 %v3622_v5, %v1818_v1  ;;  %v1831_v62 = vld [vmem:[%s3615_s12 + $0x78] sm:$0xff] }
 0x5b5   : > { %v1839_v16 = vmul.f32 %v3622_v5, %v1819_v2  ;;  %v1840_v22 = vmul.f32 %v3622_v5, %v1820_v3  ;;  %v1841_v17 = vmul.f32 %v3622_v5, %v1821_v6  ;;  %v1842_v23 = vmul.f32 %v3622_v5, %v1822_v7  ;;  %v1882_v3 = vld [vmem:[%s3412_s4 + $0x50] sm:$0xff]  ;;  %v1883_v4 = vld [vmem:[%s3412_s4 + $0x58] sm:$0xff] }
 0x5b6   : > { %v3640_v24 = vrot.slane %v1814_v14, %v1834_v59  ;;  %v1843_v28 = vmul.f32 %v3622_v5, %v1823_v8  ;;  %v1844_v20 = vmul.f32 %v3622_v5, %v1824_v10  ;;  %v1845_v32 = vmul.f32 %v3622_v5, %v1825_v12  ;;  %v1884_v12 = vld [vmem:[%s3412_s4 + $0x60] sm:$0xff] }
 0x5b7   : > { %v1846_v36 = vmul.f32 %v3622_v5, %v1826_v13  ;;  %v1847_v37 = vmul.f32 %v3622_v5, %v1827_v9  ;;  %v1848_v38 = vmul.f32 %v3622_v5, %v1828_v11  ;;  %v1849_v39 = vmul.f32 %v3622_v5, %v1829_v21  ;;  %v1885_v13 = vld [vmem:[%s3412_s4 + $0x68] sm:$0xff] }
 0x5b8   : > { %v1856_v40 = vadd.f32 %v3640_v24, %v1836_v15  ;;  %v1857_v41 = vadd.f32 %v3640_v24, %v1837_v18  ;;  %v1858_v42 = vadd.f32 %v3640_v24, %v1838_v19  ;;  %v1859_v43 = vadd.f32 %v3640_v24, %v1839_v16 }
 0x5b9   : > { %v1860_v47 = vadd.f32 %v3640_v24, %v1840_v22  ;;  %v1861_v48 = vadd.f32 %v3640_v24, %v1841_v17  ;;  %v1862_v27 = vadd.f32 %v3640_v24, %v1842_v23  ;;  %v1863_v29 = vadd.f32 %v3640_v24, %v1843_v28  ;;  %v1886_v22 = vld [vmem:[%s3412_s4 + $0x70] sm:$0xff]  ;;  %v1887_v17 = vld [vmem:[%s3412_s4 + $0x78] sm:$0xff] }
 0x5ba   : > { %v1888_v49 = vadd.f32 %v1872_v25, %v1856_v40  ;;  %v1889_v50 = vadd.f32 %v1873_v26, %v1857_v41  ;;  %v1890_v51 = vadd.f32 %v1874_v33, %v1858_v42  ;;  %v1891_v52 = vadd.f32 %v1875_v30, %v1859_v43 }
 0x5bb   : > { %v1892_v34 = vadd.f32 %v1876_v31, %v1860_v47  ;;  %v1893_v53 = vadd.f32 %v1877_v44, %v1861_v48  ;;  %v1894_v35 = vadd.f32 %v1878_v45, %v1862_v27  ;;  %v1895_v54 = vadd.f32 %v1879_v46, %v1863_v29 }
 0x5bc   : > { %v1904_v57 = vmax.f32 %v1888_v49, 0.0  ;;  %v1905_v58 = vmax.f32 %v1889_v50, 0.0  ;;  %v1906_v59 = vmax.f32 %v1890_v51, 0.0  ;;  %v1907_v60 = vmax.f32 %v1891_v52, 0.0 }
 0x5bd   : > { %v1908_v63 = vmax.f32 %v1892_v34, 0.0  ;;  %v1909_v0 = vmax.f32 %v1893_v53, 0.0  ;;  %v1910_v1 = vmax.f32 %v1894_v35, 0.0  ;;  %v1911_v2 = vmax.f32 %v1895_v54, 0.0 }
 0x5be   : > { %1920 = vst [vmem:[%s3442_s13] sm:$0xff] %v1904_v57  ;;  %1921 = vst [vmem:[%s3442_s13 + $0x8] sm:$0xff] %v1905_v58  ;;  %v1864_v6 = vadd.f32 %v3640_v24, %v1844_v20  ;;  %v1865_v7 = vadd.f32 %v3640_v24, %v1845_v32  ;;  %v1866_v8 = vadd.f32 %v3640_v24, %v1846_v36 }
 0x5bf   : > { %1922 = vst [vmem:[%s3442_s13 + $0x10] sm:$0xff] %v1906_v59  ;;  %1923 = vst [vmem:[%s3442_s13 + $0x18] sm:$0xff] %v1907_v60  ;;  %v1867_v10 = vadd.f32 %v3640_v24, %v1847_v37  ;;  %v1868_v14 = vadd.f32 %v3640_v24, %v1848_v38  ;;  %v1869_v15 = vadd.f32 %v3640_v24, %v1849_v39 }
 0x5c0   : > { %1924 = vst [vmem:[%s3442_s13 + $0x20] sm:$0xff] %v1908_v63  ;;  %1925 = vst [vmem:[%s3442_s13 + $0x28] sm:$0xff] %v1909_v0  ;;  %v1850_v18 = vmul.f32 %v3622_v5, %v1830_v61  ;;  %v1851_v19 = vmul.f32 %v3622_v5, %v1831_v62  ;;  %v1896_v9 = vadd.f32 %v1880_v55, %v1864_v6 }
 0x5c1   : > { %1926 = vst [vmem:[%s3442_s13 + $0x30] sm:$0xff] %v1910_v1  ;;  %1927 = vst [vmem:[%s3442_s13 + $0x38] sm:$0xff] %v1911_v2  ;;  %v1897_v11 = vadd.f32 %v1881_v56, %v1865_v7  ;;  %v1898_v21 = vadd.f32 %v1882_v3, %v1866_v8  ;;  %v1899_v16 = vadd.f32 %v1883_v4, %v1867_v10 }
 0x5c2   : > { %v1900_v23 = vadd.f32 %v1884_v12, %v1868_v14  ;;  %v1901_v25 = vadd.f32 %v1885_v13, %v1869_v15  ;;  %v1870_v26 = vadd.f32 %v3640_v24, %v1850_v18  ;;  %v1871_v28 = vadd.f32 %v3640_v24, %v1851_v19 }
 0x5c3   : > { %v1912_v20 = vmax.f32 %v1896_v9, 0.0  ;;  %v1913_v5 = vmax.f32 %v1897_v11, 0.0  ;;  %v1914_v32 = vmax.f32 %v1898_v21, 0.0  ;;  %v1915_v33 = vmax.f32 %v1899_v16, 0.0 }
 0x5c4   : > { %v1916_v30 = vmax.f32 %v1900_v23, 0.0  ;;  %v1917_v31 = vmax.f32 %v1901_v25, 0.0  ;;  %v1902_v36 = vadd.f32 %v1886_v22, %v1870_v26  ;;  %v1903_v37 = vadd.f32 %v1887_v17, %v1871_v28 }
 0x5c5   : > { %1928 = vst [vmem:[%s3442_s13 + $0x40] sm:$0xff] %v1912_v20  ;;  %1929 = vst [vmem:[%s3442_s13 + $0x48] sm:$0xff] %v1913_v5 }
 0x5c6   : > { %1930 = vst [vmem:[%s3442_s13 + $0x50] sm:$0xff] %v1914_v32  ;;  %1931 = vst [vmem:[%s3442_s13 + $0x58] sm:$0xff] %v1915_v33  ;;  %v1918_v38 = vmax.f32 %v1902_v36, 0.0  ;;  %v1919_v39 = vmax.f32 %v1903_v37, 0.0 }
 0x5c7   : > { %1932 = vst [vmem:[%s3442_s13 + $0x60] sm:$0xff] %v1916_v30  ;;  %1933 = vst [vmem:[%s3442_s13 + $0x68] sm:$0xff] %v1917_v31 }
 0x5c8   : > { %1934 = vst [vmem:[%s3442_s13 + $0x70] sm:$0xff] %v1918_v38  ;;  %1935 = vst [vmem:[%s3442_s13 + $0x78] sm:$0xff] %v1919_v39 }
 0x5c9 PF: > { %s3859_s4 = sld [smem:[#allocation22_spill]]  ;;  %s3860_s11 = sld [smem:[#allocation21_spill]] }
 0x5ca   : > { %s3862_s5 = sld [smem:[#allocation25_spill]]  ;;  %s1952_s21 = sshll.u32 %s3442_s13, 4  ;;  %s3704_s21 = int_to_ptr.vmem [resolvable:$true] %s1952_s21 }
 0x5cb   : > { %s3863_s10 = sld [smem:[#allocation30_spill]]  ;;  %s3713_s9 = scalar_lea.sflag [#allocation7], %s356_s15 }
 0x5cc   : > { %s2902_s19 = scalar_lea.vmem %s3704_s21, 2048  ;;  %s3073_s13 = smov [#allocation13]  }
 0x5cd   : > { %p2903_p7 = scmp.ne.s32.totalorder %s3704_s21, %s2902_s19  ;;  %s2906_s7 = sshll.u32 %s3073_s13, 4  ;;  %s2907_s7 = int_to_ptr.vmem [resolvable:$false] %s2906_s7 }
 0x5ce   : > { %s2908_s12 = scalar_lea.vmem %s2907_s7, 4096  ;;  %p2909_p5 = scmp.lt.s32.totalorder %s3704_s21, %s2907_s7 }
 0x5cf   : > { %p1944_p9 = scmp.eq.s32.totalorder %s3859_s4, 4  ;;  %p2910_p6 = scmp.lt.s32.totalorder %s2908_s12, %s2902_s19 }
 0x5d0   : > { %p3864_p12 = scmp.ne.s32.totalorder %s3862_s5, 0 }
 0x5d1   : > { %s3890_s11 = smov (!%p1944_p9, %s3860_s11), 0  ;;  %p2911_p11 = por %p2910_p6, %p2909_p5 }
 0x5d2   : > { %s2185_s3 = sshll.u32 %s3890_s11, 11  ;;  %p2904_p0 = pnand %p2903_p7, %p3864_p12 }
 0x5d3   : > { %s3709_s18 = scalar_lea.hbm %s3863_s10, %s2185_s3 }
 0x5d4   : > { %p2905_p1 = pneg %p2904_p0 }
 0x5d6   : > { %p2912_p13 = pnand %p2911_p11, %p2905_p1 }
 0x5d8   : > { %2915 = shalt.err (!%p2912_p13)
}
 0x5d9   : > { %s2916_s15 = scalar_lea.hbm %s3709_s18, 2048  ;;  %s2920_s8 = scalar_lea.hbm %s3863_s10, 6144 }
 0x5da   : > { %p2917_p2 = scmp.ne.s32.totalorder %s3709_s18, %s2916_s15  ;;  %p2921_p10 = scmp.lt.u32.totalorder %s3709_s18, %s3863_s10 }
 0x5db   : > { %p2922_p4 = scmp.lt.u32.totalorder %s2920_s8, %s2916_s15  ;;  %p2924_p7 = scmp.lt.u32.totalorder %s2916_s15, %s3709_s18 }
 0x5dc   : > { %p2918_p3 = pnand %p2917_p2, %p3864_p12 }
 0x5dd   : > { %p2923_p9 = por %p2922_p4, %p2921_p10 }
 0x5de   : > { %p2919_p8 = pneg %p2918_p3 }
 0x5df   : > { %p2925_p0 = por %p2924_p7, %p2923_p9 }
 0x5e1   : > { %p2926_p1 = pnand %p2925_p0, %p2919_p8 }
 0x5e3   : > { %2929 = shalt.err (!%p2926_p1)
}
 0x5e4   : > { %s3074_s14 = smov 128   ;;  %s3075_s19 = smov 8  }
 0x5e5   : > { %2553 = dma.vmem_to_hbm [thread:$0]  (%p3864_p12), %s3704_s21, 2048, %s3709_s18, %s3713_s9, %s3074_s14, %s3074_s14, %s3075_s19  }
 0x5e6 PF: > { %s3865_s13 = sld [smem:[#allocation19_spill]]  ;;  %s3866_s7 = sld [smem:[#allocation26_spill]] }
 0x5e7   : > { %p2578_p5 = scmp.ge.s32.totalorder %s3060_s6, 2 }
 0x5ec   : > { %s1967_s12 = sand.u32 1, %s3865_s13   ;;  %p3867_p6 = scmp.ne.s32.totalorder %s3866_s7, 0 }
 0x5ed   : > { %s1968_s15 = scalar_lea.sflag [#allocation7], %s1967_s12 }
 0x5ee   : > { %p2570_p11 = pnand %p2578_p5, %p3867_p6 }
 0x5f0   : > { %3003 = dma.done.wait (!%p2570_p11), %s1968_s15, 2048  }
 0x5f1   : > { %3005 = vsyncadd (!%p2570_p11), %s1968_s15, 4294965248  ;;  %s25_s6 = sadd.s32 1, %s3060_s6   ;;  %s3869_s18 = sld [smem:[#allocation20_spill]] }
 0x5f2   : > { %p3742_p13 = scmp.ge.s32.totalorder %s25_s6, 17   ;;  %s3870_s5 = smov %s3884_s28 }
 0x5f3   : > { %s3871_s19 = smov %s3016_s20  ;;  %s3872_s20 = smov %s3302_s27 }
 0x5f4   : > { %s3873_s21 = smov %s3024_s22  ;;  %s3874_s22 = smov %s3028_s23 }
 0x5f5   : > { %s3875_s23 = smov %s3372_s16  ;;  %s3876_s24 = smov %s3036_s25 }
 0x5f6   : > { %s3877_s25 = smov %s3040_s26  ;;  %s3878_s26 = smov %s3305_s2 }
 0x5f7   : > { %s3879_s27 = smov %s3052_s29  ;;  %s3880_s28 = smov %s3056_s30 }
 0x5f8   : > { %s3881_s29 = smov %s3870_s5  ;;  %s3882_s30 = smov %s3888_s17 }
 0x5f9   :  { %24 = sbr.rel (!%p3742_p13) target bundleno = 18 (0x12), region = 136 }
 0x600   :  { %1973 = vsyncpa [#allocation6], 1 }
 0x601   :  { %1975 = vsyncpa [#allocation6 + $0x1], 1 }
 0x602   :  { %1976 = vsyncpa [#allocation9], 1 }
 0x603   :  { %1978 = vsyncpa [#allocation9 + $0x1], 1 }
 0x604   :  { %1979 = vsyncpa [#allocation12], 1 }
 0x605   :  { %1980 = vsyncpa [#allocation7], 1 }
 0x606   :  { %1982 = vsyncpa [#allocation7 + $0x1], 1 }

</bundles_post_ra>
